<compile_context>
chip_gen: v6e
topology: v6e:2x2x1
jax: 0.10.0
libtpu: 0.0.40
codegen_flags: <defaults>
</compile_context>

<pallas_src>
import jax
import jax.numpy as jnp
from jax.experimental import pallas as pl
from jax.experimental.pallas import tpu as pltpu

EPS = 1e-5
NUM_NEIGHBORS = 8          # groupingMSG uses k1 = [4, 8]; 8 unique neighbors


# --------------------------------------------------------------------------
# in-kernel building blocks (operate on f32 values of shape [N, C])
# --------------------------------------------------------------------------
def _acn(x, w, b):
    """Attentive Context Normalization.  x: [N, C] f32, w: [C, 2], b: [1, 2].

    a = sigmoid(l) * softmax_N(g); a /= sum(a).  The softmax denominator
    cancels in the final normalization, so only one exact normalization is
    performed (mathematically identical to the reference, fewer VPU passes).
    """
    att = jnp.dot(x, w, preferred_element_type=jnp.float32) + b      # [N, 2]
    a_l = jax.nn.sigmoid(att[:, 0:1])                                 # [N, 1]
    g = att[:, 1:2]
    g = g - jnp.max(g, axis=0, keepdims=True)
    a = a_l * jnp.exp(g)
    a = a / jnp.sum(a, axis=0, keepdims=True)                         # exact
    mean = jnp.sum(x * a, axis=0, keepdims=True)                      # [1, C]
    out = x - mean
    inv_std = jax.lax.rsqrt(jnp.sum(a * out * out, axis=0, keepdims=True) + EPS)
    return out * inv_std


def _group_norm(x, gamma, beta, gproj):
    """GroupNorm(G, C) with the affine folded into one scale/shift pass.

    gproj: [C, C] = one_hot @ one_hot.T / (N * group_size); a single [2, C]
    matmul broadcasts the per-group mean / mean-square back to channels.
    """
    s1 = jnp.sum(x, axis=0, keepdims=True)                            # [1, C]
    s2 = jnp.sum(x * x, axis=0, keepdims=True)                        # [1, C]
    stats = jnp.dot(jnp.concatenate([s1, s2], axis=0), gproj,
                    preferred_element_type=jnp.float32)               # [2, C]
    mean_c = stats[0:1, :]
    var_c = jnp.maximum(stats[1:2, :] - mean_c * mean_c, 0.0)         # biased
    scale = jax.lax.rsqrt(var_c + EPS) * gamma                        # [1, C]
    shift = beta - mean_c * scale                                     # [1, C]
    return x * scale + shift                                          # 1 mul + 1 add


# --------------------------------------------------------------------------
# Kernel A: stem  (conv1 -> InstanceNorm -> BatchNorm(eval) -> ReLU)
# --------------------------------------------------------------------------
def _stem_kernel(d_ref, w1_ref, b1_ref, bns_ref, bnsh_ref, feat_ref):
    x = jnp.dot(d_ref[...], w1_ref[...],
                preferred_element_type=jnp.float32) + b1_ref[...]     # [N, C4]
    # InstanceNorm2d (no affine) over spatial N, per channel.
    m = jnp.mean(x, axis=0, keepdims=True)
    xc = x - m
    v = jnp.mean(xc * xc, axis=0, keepdims=True)
    x = xc * jax.lax.rsqrt(v + EPS)
    # BatchNorm2d folded to affine (eval-mode running stats), then ReLU.
    x = x * bns_ref[...] + bnsh_ref[...]
    feat_ref[...] = jnp.maximum(x, 0.0).astype(feat_ref.dtype)        # bf16 out


def stem(data_bnc, p):
    B, N, Cin = data_bnc.shape
    C4 = p["conv1_b"].shape[1]
    return pl.pallas_call(
        _stem_kernel,
        out_shape=jax.ShapeDtypeStruct((B, N, C4), jnp.bfloat16),
        grid_spec=pltpu.PrefetchScalarGridSpec(
            num_scalar_prefetch=0,
            grid=(B,),
            in_specs=[
                pl.BlockSpec((None, N, Cin), lambda b: (b, 0, 0)),
                pl.BlockSpec(p["conv1_w_t"].shape, lambda b: (0, 0)),
                pl.BlockSpec(p["conv1_b"].shape, lambda b: (0, 0)),
                pl.BlockSpec(p["bn_scale"].shape, lambda b: (0, 0)),
                pl.BlockSpec(p["bn_shift"].shape, lambda b: (0, 0)),
            ],
            out_specs=pl.BlockSpec((None, N, C4), lambda b: (b, 0, 0)),
        ),
        compiler_params=pltpu.CompilerParams(
            dimension_semantics=("parallel",)),
    )(data_bnc, p["conv1_w_t"], p["conv1_b"], p["bn_scale"], p["bn_shift"])


# --------------------------------------------------------------------------
# Kernel B: conv2 (single K=2C matmul) + all ARB blocks + output conv.
# Activation is carried through an in-kernel fori_loop; every block weight is
# VMEM-resident and indexed dynamically with the loop counter.
# --------------------------------------------------------------------------
def _main_kernel(g_ref, w2_ref, c2b_ref,
                 a1w_ref, a1b_ref, g1g_ref, g1b_ref, wa_ref, ba_ref,
                 a2w_ref, a2b_ref, g2g_ref, g2b_ref, wb_ref, bb_ref,
                 gproj_ref, ow_ref, ob_ref,
                 out_ref):
    # conv2 folded with groupingMSG: [N, 8*C4] @ [8*C4, C]  (K = 2C).
    x = jnp.dot(g_ref[...], w2_ref[...],
                preferred_element_type=jnp.float32) + c2b_ref[...]    # [N, C]

    gproj = gproj_ref[...]                                            # hoisted
    nb = a1w_ref.shape[0]

    def block(i, x):
        h = _acn(x, a1w_ref[i], a1b_ref[i])
        h = _group_norm(h, g1g_ref[i], g1b_ref[i], gproj)
        h = jnp.maximum(h, 0.0)
        h = jnp.dot(h.astype(jnp.bfloat16), wa_ref[i],
                    preferred_element_type=jnp.float32) + ba_ref[i]
        h = _acn(h, a2w_ref[i], a2b_ref[i])
        h = _group_norm(h, g2g_ref[i], g2b_ref[i], gproj)
        h = jnp.maximum(h, 0.0)
        h = jnp.dot(h.astype(jnp.bfloat16), wb_ref[i],
                    preferred_element_type=jnp.float32) + bb_ref[i]
        return x + h                                                  # residual

    x = jax.lax.fori_loop(0, nb, block, x)

    # Output 1x1 conv, lane-dense [1, N] store:
    # logits[0, n] = sum_c w[0, c] * x[n, c] + b
    logits = jax.lax.dot_general(
        ow_ref[...], x, (((1,), (1,)), ((), ())),
        preferred_element_type=jnp.float32) + ob_ref[...]
    out_ref[...] = logits


def lmc_main(grouped, p):
    B, N, K2 = grouped.shape
    C = p["conv2_b"].shape[1]
    nb = p["cva_w_t"].shape[0]
    gm = p["group_map"]                                   # [C, G] one-hot
    gs = C // gm.shape[1]
    group_proj = (jnp.dot(gm, gm.T) / float(N * gs)).astype(jnp.float32)

    ins = [
        grouped, p["conv2_w_flat"], p["conv2_b"],
        p["acn1_w_t"], p["acn1_b"], p["gn1_g"], p["gn1_b"],
        p["cva_w_t"], p["cva_b"],
        p["acn2_w_t"], p["acn2_b"], p["gn2_g"], p["gn2_b"],
        p["cvb_w_t"], p["cvb_b"],
        group_proj, p["out_w_row"], p["out_b"],
    ]

    def const(a):
        return pl.BlockSpec(a.shape, lambda b, _nd=a.ndim: (0,) * _nd)

    in_specs = ([pl.BlockSpec((None, N, K2), lambda b: (b, 0, 0))]
                + [const(a) for a in ins[1:]])

    flops = (2 * B * N * (K2 * C + C)
             + B * nb * (4 * N * C * C + 8 * N * C + 8 * C * C))
    transcendentals = 4 * B * N * nb
    bytes_accessed = (sum(int(a.size) * a.dtype.itemsize for a in ins)
                      + B * N * 4)

    out = pl.pallas_call(
        _main_kernel,
        out_shape=jax.ShapeDtypeStruct((B, 1, N), jnp.float32),
        grid_spec=pltpu.PrefetchScalarGridSpec(
            num_scalar_prefetch=0,
            grid=(B,),
            in_specs=in_specs,
            out_specs=pl.BlockSpec((None, 1, N), lambda b: (b, 0, 0)),
        ),
        compiler_params=pltpu.CompilerParams(
            dimension_semantics=("parallel",),       # B >= 2 splits v7x TCs
            vmem_limit_bytes=48 * 1024 * 1024),
        cost_estimate=pl.CostEstimate(flops=int(flops),
                                      transcendentals=int(transcendentals),
                                      bytes_accessed=int(bytes_accessed)),
    )(*ins)
    return out[:, 0, :]                                   # [B, N]


# --------------------------------------------------------------------------
# full forward (matches LMC_network.forward(nn_index, data, xs))
# --------------------------------------------------------------------------
def lmc_forward(nn_index, data_nchw, xs, params, depth):
    del xs, depth                                          # xs unused; depth static
    B = data_nchw.shape[0]
    data = jnp.transpose(data_nchw[..., 0], (0, 2, 1))     # [B, N, Cin]
    idx = nn_index[..., :NUM_NEIGHBORS].astype(jnp.int32)  # [B, N, 8]

    feat = stem(data, params)                              # [B, N, C4] bf16 (Pallas)
    # groupingMSG neighbor gather (data movement only) at the XLA level.
    gathered = jax.vmap(lambda f, i: f[i])(feat, idx)      # [B, N, 8, C4]
    grouped = gathered.reshape(B, feat.shape[1], -1)       # [B, N, 8*C4]

    return lmc_main(grouped, params)                       # [B, N] (Pallas)


# --------------------------------------------------------------------------
# deterministic synthetic parameters (PyTorch [Cout, Cin, 1, 1] weights are
# generated directly as [Cin, Cout] transposed matrices).
# --------------------------------------------------------------------------
def init_params(key, channels, input_channel, depth, num_groups=32):
    C = channels
    C4 = C // 4
    nb = depth * 2
    assert C % 4 == 0 and C % num_groups == 0
    keys = iter(jax.random.split(key, 40))

    def w(shape, scale=0.1):
        return scale * jax.random.normal(next(keys), shape, jnp.float32)

    p = {}
    # stem: conv1; InstanceNorm has no params; BatchNorm2d folded to affine
    # (eval mode, running_mean=0 / running_var=1).
    p["conv1_w_t"] = w((input_channel, C4))
    p["conv1_b"] = w((1, C4))
    bn_gamma = 1.0 + w((1, C4))
    bn_beta = w((1, C4))
    p["bn_scale"] = bn_gamma / jnp.sqrt(1.0 + EPS)
    p["bn_shift"] = bn_beta

    # conv2 folded with groupingMSG (k1=[4,8]):
    #   conv2(grouped_12) == grouped_8 @ W_flat,
    #   W_eff[j] = W_g8[j] (+ W_g4[j] for j < 4),  W_flat = W_eff.reshape(8*C4, C)
    conv2_w_t = w((3 * C, C))                             # 12*C4 rows
    w_g4 = conv2_w_t[:4 * C4].reshape(4, C4, C)
    w_g8 = conv2_w_t[4 * C4:].reshape(8, C4, C)
    w_eff = w_g8.at[:4].add(w_g4)                         # [8, C4, C]
    p["conv2_w_flat"] = w_eff.reshape(8 * C4, C).astype(jnp.bfloat16)
    p["conv2_b"] = w((1, C))

    # ARB blocks, stacked along axis 0; resident in VMEM and indexed in-kernel.
    p["acn1_w_t"] = w((nb, C, 2))
    p["acn1_b"] = w((nb, 1, 2))
    p["gn1_g"] = 1.0 + w((nb, 1, C))
    p["gn1_b"] = w((nb, 1, C))
    p["cva_w_t"] = w((nb, C, C)).astype(jnp.bfloat16)     # MXU operands in bf16
    p["cva_b"] = w((nb, 1, C))
    p["acn2_w_t"] = w((nb, C, 2))
    p["acn2_b"] = w((nb, 1, 2))
    p["gn2_g"] = 1.0 + w((nb, 1, C))
    p["gn2_b"] = w((nb, 1, C))
    p["cvb_w_t"] = w((nb, C, C)).astype(jnp.bfloat16)
    p["cvb_b"] = w((nb, 1, C))

    # output conv stored as a lane row so logits are produced lane-dense [1, N].
    p["out_w_row"] = w((1, C))
    p["out_b"] = w((1, 1))

    # GroupNorm(num_groups, C) one-hot group assignment (projector built in wrapper).
    gs = C // num_groups
    c_idx = jnp.arange(C) // gs
    p["group_map"] = (c_idx[:, None] == jnp.arange(num_groups)[None, :]
                      ).astype(jnp.float32)
    return p


if __name__ == "__main__":
    B, N, Cin = 2, 16, 4
    channels, depth = 32, 1          # GroupNorm(32, .) requires channels % 32 == 0

    key = jax.random.PRNGKey(0)
    k1, k2, k3 = jax.random.split(key, 3)
    data_nchw = jax.random.normal(k1, (B, Cin, N, 1), jnp.float32)
    nn_index = jax.random.randint(k2, (B, N, 8), 0, N, dtype=jnp.int32)
    xs = jax.random.normal(k3, (B, 1, N, 4), jnp.float32)   # unused by forward

    params = init_params(jax.random.PRNGKey(42), channels, Cin, depth)

    fwd = jax.jit(lmc_forward, static_argnums=(4,))
    logits = fwd(nn_index, data_nchw, xs, params, depth)
    logits = jax.block_until_ready(logits)
    assert logits.shape == (B, N) and logits.dtype == jnp.float32
    print("KERNEL_OK")
</pallas_src>

<mosaic_0001>
module attributes {stable_mosaic.version = 11 : i64} {
  func.func @_stem_kernel(%arg0: i32, %arg1: memref<1x16x4xf32, #tpu.memory_space<vmem>>, %arg2: memref<4x8xf32, #tpu.memory_space<vmem>>, %arg3: memref<1x8xf32, #tpu.memory_space<vmem>>, %arg4: memref<1x8xf32, #tpu.memory_space<vmem>>, %arg5: memref<1x8xf32, #tpu.memory_space<vmem>>, %arg6: memref<1x16x8xbf16, #tpu.memory_space<vmem>>) attributes {dimension_semantics = [#tpu.dimension_semantics<parallel>], iteration_bounds = array<i64: 2>, scalar_prefetch = 0 : i64, scratch_operands = 0 : i64, tpu.core_type = #tpu.core_type<tc>, window_params = [{transform_indices = @transform_0, window_bounds = array<i64: 1, 16, 4>}, {pipeline_mode = #tpu.pipeline_mode<synchronous>, transform_indices = @transform_1, window_bounds = array<i64: 4, 8>}, {pipeline_mode = #tpu.pipeline_mode<synchronous>, transform_indices = @transform_2, window_bounds = array<i64: 1, 8>}, {pipeline_mode = #tpu.pipeline_mode<synchronous>, transform_indices = @transform_3, window_bounds = array<i64: 1, 8>}, {pipeline_mode = #tpu.pipeline_mode<synchronous>, transform_indices = @transform_4, window_bounds = array<i64: 1, 8>}, {transform_indices = @transform_5, window_bounds = array<i64: 1, 16, 8>}]} {
    %c0 = arith.constant 0 : index
    %c0_0 = arith.constant 0 : index
    %c0_1 = arith.constant 0 : index
    %0 = vector.load %arg1[%c0, %c0_0, %c0_1] : memref<1x16x4xf32, #tpu.memory_space<vmem>>, vector<1x16x4xf32>
    %1 = vector.shape_cast %0 : vector<1x16x4xf32> to vector<16x4xf32>
    %c0_2 = arith.constant 0 : index
    %c0_3 = arith.constant 0 : index
    %2 = vector.load %arg2[%c0_2, %c0_3] : memref<4x8xf32, #tpu.memory_space<vmem>>, vector<4x8xf32>
    %cst = arith.constant dense<0.000000e+00> : vector<16x8xf32>
    %3 = tpu.matmul %1, %2, %cst {dimension_numbers = #tpu.dot_dimension_numbers<[1], [0], [0], [1], [0, 0, 1, 1], [], []>} : vector<16x4xf32>, vector<4x8xf32>, vector<16x8xf32> -> vector<16x8xf32>
    %c0_4 = arith.constant 0 : index
    %c0_5 = arith.constant 0 : index
    %4 = vector.load %arg3[%c0_4, %c0_5] : memref<1x8xf32, #tpu.memory_space<vmem>>, vector<1x8xf32>
    %5 = vector.broadcast %4 : vector<1x8xf32> to vector<16x8xf32>
    %6 = arith.addf %3, %5 : vector<16x8xf32>
    %cst_6 = arith.constant dense<0.000000e+00> : vector<8xf32>
    %7 = vector.multi_reduction <add>, %6, %cst_6 [0] : vector<16x8xf32> to vector<8xf32>
    %8 = vector.shape_cast %7 : vector<8xf32> to vector<1x8xf32>
    %cst_7 = arith.constant 1.600000e+01 : f32
    %9 = vector.broadcast %cst_7 : f32 to vector<1x8xf32>
    %10 = arith.divf %8, %9 : vector<1x8xf32>
    %11 = vector.broadcast %10 : vector<1x8xf32> to vector<16x8xf32>
    %12 = arith.subf %6, %11 : vector<16x8xf32>
    %13 = arith.mulf %12, %12 : vector<16x8xf32>
    %cst_8 = arith.constant dense<0.000000e+00> : vector<8xf32>
    %14 = vector.multi_reduction <add>, %13, %cst_8 [0] : vector<16x8xf32> to vector<8xf32>
    %15 = vector.shape_cast %14 : vector<8xf32> to vector<1x8xf32>
    %cst_9 = arith.constant 1.600000e+01 : f32
    %16 = vector.broadcast %cst_9 : f32 to vector<1x8xf32>
    %17 = arith.divf %15, %16 : vector<1x8xf32>
    %cst_10 = arith.constant 9.99999974E-6 : f32
    %18 = vector.broadcast %cst_10 : f32 to vector<1x8xf32>
    %19 = arith.addf %17, %18 : vector<1x8xf32>
    %20 = math.rsqrt %19 : vector<1x8xf32>
    %21 = vector.broadcast %20 : vector<1x8xf32> to vector<16x8xf32>
    %22 = arith.mulf %12, %21 : vector<16x8xf32>
    %c0_11 = arith.constant 0 : index
    %c0_12 = arith.constant 0 : index
    %23 = vector.load %arg4[%c0_11, %c0_12] : memref<1x8xf32, #tpu.memory_space<vmem>>, vector<1x8xf32>
    %24 = vector.broadcast %23 : vector<1x8xf32> to vector<16x8xf32>
    %25 = arith.mulf %22, %24 : vector<16x8xf32>
    %c0_13 = arith.constant 0 : index
    %c0_14 = arith.constant 0 : index
    %26 = vector.load %arg5[%c0_13, %c0_14] : memref<1x8xf32, #tpu.memory_space<vmem>>, vector<1x8xf32>
    %27 = vector.broadcast %26 : vector<1x8xf32> to vector<16x8xf32>
    %28 = arith.addf %25, %27 : vector<16x8xf32>
    %cst_15 = arith.constant 0.000000e+00 : f32
    %29 = vector.broadcast %cst_15 : f32 to vector<16x8xf32>
    %30 = arith.maximumf %28, %29 : vector<16x8xf32>
    %31 = arith.truncf %30 : vector<16x8xf32> to vector<16x8xbf16>
    %c0_16 = arith.constant 0 : index
    %c0_17 = arith.constant 0 : index
    %c0_18 = arith.constant 0 : index
    %32 = vector.load %arg6[%c0_16, %c0_17, %c0_18] : memref<1x16x8xbf16, #tpu.memory_space<vmem>>, vector<1x16x8xbf16>
    %33 = vector.shape_cast %32 : vector<1x16x8xbf16> to vector<16x8xbf16>
    %34 = vector.shape_cast %31 : vector<16x8xbf16> to vector<1x16x8xbf16>
    tpu.vector_store %arg6[%c0_16, %c0_17, %c0_18], %34 {strides = array<i32>} : memref<1x16x8xbf16, #tpu.memory_space<vmem>>, vector<1x16x8xbf16>,
    return
  }
  func.func @transform_0(%arg0: i32) -> (i32, i32, i32) {
    %c0_i32 = arith.constant 0 : i32
    %c0_i32_0 = arith.constant 0 : i32
    %c0_i32_1 = arith.constant 0 : i32
    return %arg0, %c0_i32, %c0_i32_0 : i32, i32, i32
  }
  func.func @transform_1(%arg0: i32) -> (i32, i32) {
    %c0_i32 = arith.constant 0 : i32
    %c0_i32_0 = arith.constant 0 : i32
    %c0_i32_1 = arith.constant 0 : i32
    return %c0_i32, %c0_i32_0 : i32, i32
  }
  func.func @transform_2(%arg0: i32) -> (i32, i32) {
    %c0_i32 = arith.constant 0 : i32
    %c0_i32_0 = arith.constant 0 : i32
    %c0_i32_1 = arith.constant 0 : i32
    return %c0_i32, %c0_i32_0 : i32, i32
  }
  func.func @transform_3(%arg0: i32) -> (i32, i32) {
    %c0_i32 = arith.constant 0 : i32
    %c0_i32_0 = arith.constant 0 : i32
    %c0_i32_1 = arith.constant 0 : i32
    return %c0_i32, %c0_i32_0 : i32, i32
  }
  func.func @transform_4(%arg0: i32) -> (i32, i32) {
    %c0_i32 = arith.constant 0 : i32
    %c0_i32_0 = arith.constant 0 : i32
    %c0_i32_1 = arith.constant 0 : i32
    return %c0_i32, %c0_i32_0 : i32, i32
  }
  func.func @transform_5(%arg0: i32) -> (i32, i32, i32) {
    %c0_i32 = arith.constant 0 : i32
    %c0_i32_0 = arith.constant 0 : i32
    %c0_i32_1 = arith.constant 0 : i32
    return %arg0, %c0_i32, %c0_i32_0 : i32, i32, i32
  }
}

module attributes {stable_mosaic.version = 11 : i64} {
  func.func @_main_kernel(%arg0: i32, %arg1: memref<1x16x64xbf16, #tpu.memory_space<vmem>>, %arg2: memref<64x32xbf16, #tpu.memory_space<vmem>>, %arg3: memref<1x32xf32, #tpu.memory_space<vmem>>, %arg4: memref<2x32x2xf32, #tpu.memory_space<vmem>>, %arg5: memref<2x1x2xf32, #tpu.memory_space<vmem>>, %arg6: memref<2x1x32xf32, #tpu.memory_space<vmem>>, %arg7: memref<2x1x32xf32, #tpu.memory_space<vmem>>, %arg8: memref<2x32x32xbf16, #tpu.memory_space<vmem>>, %arg9: memref<2x1x32xf32, #tpu.memory_space<vmem>>, %arg10: memref<2x32x2xf32, #tpu.memory_space<vmem>>, %arg11: memref<2x1x2xf32, #tpu.memory_space<vmem>>, %arg12: memref<2x1x32xf32, #tpu.memory_space<vmem>>, %arg13: memref<2x1x32xf32, #tpu.memory_space<vmem>>, %arg14: memref<2x32x32xbf16, #tpu.memory_space<vmem>>, %arg15: memref<2x1x32xf32, #tpu.memory_space<vmem>>, %arg16: memref<32x32xf32, #tpu.memory_space<vmem>>, %arg17: memref<1x32xf32, #tpu.memory_space<vmem>>, %arg18: memref<1x1xf32, #tpu.memory_space<vmem>>, %arg19: memref<1x1x16xf32, #tpu.memory_space<vmem>>) attributes {dimension_semantics = [#tpu.dimension_semantics<parallel>], iteration_bounds = array<i64: 2>, scalar_prefetch = 0 : i64, scratch_operands = 0 : i64, tpu.core_type = #tpu.core_type<tc>, window_params = [{transform_indices = @transform_0, window_bounds = array<i64: 1, 16, 64>}, {pipeline_mode = #tpu.pipeline_mode<synchronous>, transform_indices = @transform_1, window_bounds = array<i64: 64, 32>}, {pipeline_mode = #tpu.pipeline_mode<synchronous>, transform_indices = @transform_2, window_bounds = array<i64: 1, 32>}, {pipeline_mode = #tpu.pipeline_mode<synchronous>, transform_indices = @transform_3, window_bounds = array<i64: 2, 32, 2>}, {pipeline_mode = #tpu.pipeline_mode<synchronous>, transform_indices = @transform_4, window_bounds = array<i64: 2, 1, 2>}, {pipeline_mode = #tpu.pipeline_mode<synchronous>, transform_indices = @transform_5, window_bounds = array<i64: 2, 1, 32>}, {pipeline_mode = #tpu.pipeline_mode<synchronous>, transform_indices = @transform_6, window_bounds = array<i64: 2, 1, 32>}, {pipeline_mode = #tpu.pipeline_mode<synchronous>, transform_indices = @transform_7, window_bounds = array<i64: 2, 32, 32>}, {pipeline_mode = #tpu.pipeline_mode<synchronous>, transform_indices = @transform_8, window_bounds = array<i64: 2, 1, 32>}, {pipeline_mode = #tpu.pipeline_mode<synchronous>, transform_indices = @transform_9, window_bounds = array<i64: 2, 32, 2>}, {pipeline_mode = #tpu.pipeline_mode<synchronous>, transform_indices = @transform_10, window_bounds = array<i64: 2, 1, 2>}, {pipeline_mode = #tpu.pipeline_mode<synchronous>, transform_indices = @transform_11, window_bounds = array<i64: 2, 1, 32>}, {pipeline_mode = #tpu.pipeline_mode<synchronous>, transform_indices = @transform_12, window_bounds = array<i64: 2, 1, 32>}, {pipeline_mode = #tpu.pipeline_mode<synchronous>, transform_indices = @transform_13, window_bounds = array<i64: 2, 32, 32>}, {pipeline_mode = #tpu.pipeline_mode<synchronous>, transform_indices = @transform_14, window_bounds = array<i64: 2, 1, 32>}, {pipeline_mode = #tpu.pipeline_mode<synchronous>, transform_indices = @transform_15, window_bounds = array<i64: 32, 32>}, {pipeline_mode = #tpu.pipeline_mode<synchronous>, transform_indices = @transform_16, window_bounds = array<i64: 1, 32>}, {pipeline_mode = #tpu.pipeline_mode<synchronous>, transform_indices = @transform_17, window_bounds = array<i64: 1, 1>}, {transform_indices = @transform_18, window_bounds = array<i64: 1, 1, 16>}]} {
    %c0 = arith.constant 0 : index
    %c0_0 = arith.constant 0 : index
    %c0_1 = arith.constant 0 : index
    %0 = vector.load %arg1[%c0, %c0_0, %c0_1] : memref<1x16x64xbf16, #tpu.memory_space<vmem>>, vector<1x16x64xbf16>
    %1 = vector.shape_cast %0 : vector<1x16x64xbf16> to vector<16x64xbf16>
    %c0_2 = arith.constant 0 : index
    %c0_3 = arith.constant 0 : index
    %2 = vector.load %arg2[%c0_2, %c0_3] : memref<64x32xbf16, #tpu.memory_space<vmem>>, vector<64x32xbf16>
    %cst = arith.constant dense<0.000000e+00> : vector<16x32xf32>
    %3 = tpu.matmul %1, %2, %cst {dimension_numbers = #tpu.dot_dimension_numbers<[1], [0], [0], [1], [0, 0, 1, 1], [], []>} : vector<16x64xbf16>, vector<64x32xbf16>, vector<16x32xf32> -> vector<16x32xf32>
    %c0_4 = arith.constant 0 : index
    %c0_5 = arith.constant 0 : index
    %4 = vector.load %arg3[%c0_4, %c0_5] : memref<1x32xf32, #tpu.memory_space<vmem>>, vector<1x32xf32>
    %5 = vector.broadcast %4 : vector<1x32xf32> to vector<16x32xf32>
    %6 = arith.addf %3, %5 : vector<16x32xf32>
    %c0_6 = arith.constant 0 : index
    %c0_7 = arith.constant 0 : index
    %7 = vector.load %arg16[%c0_6, %c0_7] : memref<32x32xf32, #tpu.memory_space<vmem>>, vector<32x32xf32>
    %c0_i32 = arith.constant 0 : i32
    %c2_i32 = arith.constant 2 : i32
    %8 = arith.addi %c0_i32, %c2_i32 : i32
    %c1_i32 = arith.constant 1 : i32
    %9 = scf.for %arg20 = %c0_i32 to %8 step %c1_i32 iter_args(%arg21 = %6) -> (vector<16x32xf32>)  : i32 {
      %18 = arith.index_cast %arg20 : i32 to index
      %c0_17 = arith.constant 0 : index
      %c0_18 = arith.constant 0 : index
      %19 = vector.load %arg4[%18, %c0_17, %c0_18] : memref<2x32x2xf32, #tpu.memory_space<vmem>>, vector<1x32x2xf32>
      %20 = vector.shape_cast %19 : vector<1x32x2xf32> to vector<32x2xf32>
      %21 = arith.index_cast %arg20 : i32 to index
      %c0_19 = arith.constant 0 : index
      %c0_20 = arith.constant 0 : index
      %22 = vector.load %arg5[%21, %c0_19, %c0_20] : memref<2x1x2xf32, #tpu.memory_space<vmem>>, vector<1x1x2xf32>
      %23 = vector.shape_cast %22 : vector<1x1x2xf32> to vector<1x2xf32>
      %cst_21 = arith.constant dense<0.000000e+00> : vector<16x2xf32>
      %24 = tpu.matmul %arg21, %20, %cst_21 {dimension_numbers = #tpu.dot_dimension_numbers<[1], [0], [0], [1], [0, 0, 1, 1], [], []>} : vector<16x32xf32>, vector<32x2xf32>, vector<16x2xf32> -> vector<16x2xf32>
      %25 = vector.broadcast %23 : vector<1x2xf32> to vector<16x2xf32>
      %26 = arith.addf %24, %25 : vector<16x2xf32>
      %27 = vector.extract_strided_slice %26 {offsets = [0, 0], sizes = [16, 1], strides = [1, 1]} : vector<16x2xf32> to vector<16x1xf32>
      %28 = arith.negf %27 : vector<16x1xf32>
      %29 = math.exp %28 : vector<16x1xf32>
      %cst_22 = arith.constant 1.000000e+00 : f32
      %30 = vector.broadcast %cst_22 : f32 to vector<16x1xf32>
      %31 = arith.addf %30, %29 : vector<16x1xf32>
      %32 = arith.divf %30, %31 : vector<16x1xf32>
      %33 = vector.extract_strided_slice %26 {offsets = [0, 1], sizes = [16, 1], strides = [1, 1]} : vector<16x2xf32> to vector<16x1xf32>
      %cst_23 = arith.constant dense<0xFF800000> : vector<1xf32>
      %34 = vector.multi_reduction <maximumf>, %33, %cst_23 [0] : vector<16x1xf32> to vector<1xf32>
      %35 = vector.shape_cast %34 : vector<1xf32> to vector<1x1xf32>
      %36 = vector.broadcast %35 : vector<1x1xf32> to vector<16x1xf32>
      %37 = arith.subf %33, %36 : vector<16x1xf32>
      %38 = math.exp %37 : vector<16x1xf32>
      %39 = arith.mulf %32, %38 : vector<16x1xf32>
      %cst_24 = arith.constant dense<0.000000e+00> : vector<1xf32>
      %40 = vector.multi_reduction <add>, %39, %cst_24 [0] : vector<16x1xf32> to vector<1xf32>
      %41 = vector.shape_cast %40 : vector<1xf32> to vector<1x1xf32>
      %42 = vector.broadcast %41 : vector<1x1xf32> to vector<16x1xf32>
      %43 = arith.divf %39, %42 : vector<16x1xf32>
      %44 = vector.broadcast %43 : vector<16x1xf32> to vector<16x32xf32>
      %45 = arith.mulf %arg21, %44 : vector<16x32xf32>
      %cst_25 = arith.constant dense<0.000000e+00> : vector<32xf32>
      %46 = vector.multi_reduction <add>, %45, %cst_25 [0] : vector<16x32xf32> to vector<32xf32>
      %47 = vector.shape_cast %46 : vector<32xf32> to vector<1x32xf32>
      %48 = vector.broadcast %47 : vector<1x32xf32> to vector<16x32xf32>
      %49 = arith.subf %arg21, %48 : vector<16x32xf32>
      %50 = vector.broadcast %43 : vector<16x1xf32> to vector<16x32xf32>
      %51 = arith.mulf %50, %49 : vector<16x32xf32>
      %52 = arith.mulf %51, %49 : vector<16x32xf32>
      %cst_26 = arith.constant dense<0.000000e+00> : vector<32xf32>
      %53 = vector.multi_reduction <add>, %52, %cst_26 [0] : vector<16x32xf32> to vector<32xf32>
      %54 = vector.shape_cast %53 : vector<32xf32> to vector<1x32xf32>
      %cst_27 = arith.constant 9.99999974E-6 : f32
      %55 = vector.broadcast %cst_27 : f32 to vector<1x32xf32>
      %56 = arith.addf %54, %55 : vector<1x32xf32>
      %57 = math.rsqrt %56 : vector<1x32xf32>
      %58 = vector.broadcast %57 : vector<1x32xf32> to vector<16x32xf32>
      %59 = arith.mulf %49, %58 : vector<16x32xf32>
      %60 = arith.index_cast %arg20 : i32 to index
      %c0_28 = arith.constant 0 : index
      %c0_29 = arith.constant 0 : index
      %61 = vector.load %arg6[%60, %c0_28, %c0_29] : memref<2x1x32xf32, #tpu.memory_space<vmem>>, vector<1x1x32xf32>
      %62 = vector.shape_cast %61 : vector<1x1x32xf32> to vector<1x32xf32>
      %63 = arith.index_cast %arg20 : i32 to index
      %c0_30 = arith.constant 0 : index
      %c0_31 = arith.constant 0 : index
      %64 = vector.load %arg7[%63, %c0_30, %c0_31] : memref<2x1x32xf32, #tpu.memory_space<vmem>>, vector<1x1x32xf32>
      %65 = vector.shape_cast %64 : vector<1x1x32xf32> to vector<1x32xf32>
      %cst_32 = arith.constant dense<0.000000e+00> : vector<32xf32>
      %66 = vector.multi_reduction <add>, %59, %cst_32 [0] : vector<16x32xf32> to vector<32xf32>
      %67 = vector.shape_cast %66 : vector<32xf32> to vector<1x32xf32>
      %68 = arith.mulf %59, %59 : vector<16x32xf32>
      %cst_33 = arith.constant dense<0.000000e+00> : vector<32xf32>
      %69 = vector.multi_reduction <add>, %68, %cst_33 [0] : vector<16x32xf32> to vector<32xf32>
      %70 = vector.shape_cast %69 : vector<32xf32> to vector<1x32xf32>
      %71 = tpu.concatenate %67, %70 in 0 : vector<1x32xf32>, vector<1x32xf32> -> vector<2x32xf32>
      %cst_34 = arith.constant dense<0.000000e+00> : vector<2x32xf32>
      %72 = tpu.matmul %71, %7, %cst_34 {dimension_numbers = #tpu.dot_dimension_numbers<[1], [0], [0], [1], [0, 0, 1, 1], [], []>} : vector<2x32xf32>, vector<32x32xf32>, vector<2x32xf32> -> vector<2x32xf32>
      %73 = vector.extract_strided_slice %72 {offsets = [0, 0], sizes = [1, 32], strides = [1, 1]} : vector<2x32xf32> to vector<1x32xf32>
      %74 = vector.extract_strided_slice %72 {offsets = [1, 0], sizes = [1, 32], strides = [1, 1]} : vector<2x32xf32> to vector<1x32xf32>
      %75 = arith.mulf %73, %73 : vector<1x32xf32>
      %76 = arith.subf %74, %75 : vector<1x32xf32>
      %cst_35 = arith.constant 0.000000e+00 : f32
      %77 = vector.broadcast %cst_35 : f32 to vector<1x32xf32>
      %78 = arith.maximumf %76, %77 : vector<1x32xf32>
      %cst_36 = arith.constant 9.99999974E-6 : f32
      %79 = vector.broadcast %cst_36 : f32 to vector<1x32xf32>
      %80 = arith.addf %78, %79 : vector<1x32xf32>
      %81 = math.rsqrt %80 : vector<1x32xf32>
      %82 = arith.mulf %81, %62 : vector<1x32xf32>
      %83 = arith.mulf %73, %82 : vector<1x32xf32>
      %84 = arith.subf %65, %83 : vector<1x32xf32>
      %85 = vector.broadcast %82 : vector<1x32xf32> to vector<16x32xf32>
      %86 = arith.mulf %59, %85 : vector<16x32xf32>
      %87 = vector.broadcast %84 : vector<1x32xf32> to vector<16x32xf32>
      %88 = arith.addf %86, %87 : vector<16x32xf32>
      %cst_37 = arith.constant 0.000000e+00 : f32
      %89 = vector.broadcast %cst_37 : f32 to vector<16x32xf32>
      %90 = arith.maximumf %88, %89 : vector<16x32xf32>
      %91 = arith.truncf %90 : vector<16x32xf32> to vector<16x32xbf16>
      %92 = arith.index_cast %arg20 : i32 to index
      %c0_38 = arith.constant 0 : index
      %c0_39 = arith.constant 0 : index
      %93 = vector.load %arg8[%92, %c0_38, %c0_39] : memref<2x32x32xbf16, #tpu.memory_space<vmem>>, vector<1x32x32xbf16>
      %94 = vector.shape_cast %93 : vector<1x32x32xbf16> to vector<32x32xbf16>
      %cst_40 = arith.constant dense<0.000000e+00> : vector<16x32xf32>
      %95 = tpu.matmul %91, %94, %cst_40 {dimension_numbers = #tpu.dot_dimension_numbers<[1], [0], [0], [1], [0, 0, 1, 1], [], []>} : vector<16x32xbf16>, vector<32x32xbf16>, vector<16x32xf32> -> vector<16x32xf32>
      %96 = arith.index_cast %arg20 : i32 to index
      %c0_41 = arith.constant 0 : index
      %c0_42 = arith.constant 0 : index
      %97 = vector.load %arg9[%96, %c0_41, %c0_42] : memref<2x1x32xf32, #tpu.memory_space<vmem>>, vector<1x1x32xf32>
      %98 = vector.shape_cast %97 : vector<1x1x32xf32> to vector<1x32xf32>
      %99 = vector.broadcast %98 : vector<1x32xf32> to vector<16x32xf32>
      %100 = arith.addf %95, %99 : vector<16x32xf32>
      %101 = arith.index_cast %arg20 : i32 to index
      %c0_43 = arith.constant 0 : index
      %c0_44 = arith.constant 0 : index
      %102 = vector.load %arg10[%101, %c0_43, %c0_44] : memref<2x32x2xf32, #tpu.memory_space<vmem>>, vector<1x32x2xf32>
      %103 = vector.shape_cast %102 : vector<1x32x2xf32> to vector<32x2xf32>
      %104 = arith.index_cast %arg20 : i32 to index
      %c0_45 = arith.constant 0 : index
      %c0_46 = arith.constant 0 : index
      %105 = vector.load %arg11[%104, %c0_45, %c0_46] : memref<2x1x2xf32, #tpu.memory_space<vmem>>, vector<1x1x2xf32>
      %106 = vector.shape_cast %105 : vector<1x1x2xf32> to vector<1x2xf32>
      %cst_47 = arith.constant dense<0.000000e+00> : vector<16x2xf32>
      %107 = tpu.matmul %100, %103, %cst_47 {dimension_numbers = #tpu.dot_dimension_numbers<[1], [0], [0], [1], [0, 0, 1, 1], [], []>} : vector<16x32xf32>, vector<32x2xf32>, vector<16x2xf32> -> vector<16x2xf32>
      %108 = vector.broadcast %106 : vector<1x2xf32> to vector<16x2xf32>
      %109 = arith.addf %107, %108 : vector<16x2xf32>
      %110 = vector.extract_strided_slice %109 {offsets = [0, 0], sizes = [16, 1], strides = [1, 1]} : vector<16x2xf32> to vector<16x1xf32>
      %111 = arith.negf %110 : vector<16x1xf32>
      %112 = math.exp %111 : vector<16x1xf32>
      %cst_48 = arith.constant 1.000000e+00 : f32
      %113 = vector.broadcast %cst_48 : f32 to vector<16x1xf32>
      %114 = arith.addf %113, %112 : vector<16x1xf32>
      %115 = arith.divf %113, %114 : vector<16x1xf32>
      %116 = vector.extract_strided_slice %109 {offsets = [0, 1], sizes = [16, 1], strides = [1, 1]} : vector<16x2xf32> to vector<16x1xf32>
      %cst_49 = arith.constant dense<0xFF800000> : vector<1xf32>
      %117 = vector.multi_reduction <maximumf>, %116, %cst_49 [0] : vector<16x1xf32> to vector<1xf32>
      %118 = vector.shape_cast %117 : vector<1xf32> to vector<1x1xf32>
      %119 = vector.broadcast %118 : vector<1x1xf32> to vector<16x1xf32>
      %120 = arith.subf %116, %119 : vector<16x1xf32>
      %121 = math.exp %120 : vector<16x1xf32>
      %122 = arith.mulf %115, %121 : vector<16x1xf32>
      %cst_50 = arith.constant dense<0.000000e+00> : vector<1xf32>
      %123 = vector.multi_reduction <add>, %122, %cst_50 [0] : vector<16x1xf32> to vector<1xf32>
      %124 = vector.shape_cast %123 : vector<1xf32> to vector<1x1xf32>
      %125 = vector.broadcast %124 : vector<1x1xf32> to vector<16x1xf32>
      %126 = arith.divf %122, %125 : vector<16x1xf32>
      %127 = vector.broadcast %126 : vector<16x1xf32> to vector<16x32xf32>
      %128 = arith.mulf %100, %127 : vector<16x32xf32>
      %cst_51 = arith.constant dense<0.000000e+00> : vector<32xf32>
      %129 = vector.multi_reduction <add>, %128, %cst_51 [0] : vector<16x32xf32> to vector<32xf32>
      %130 = vector.shape_cast %129 : vector<32xf32> to vector<1x32xf32>
      %131 = vector.broadcast %130 : vector<1x32xf32> to vector<16x32xf32>
      %132 = arith.subf %100, %131 : vector<16x32xf32>
      %133 = vector.broadcast %126 : vector<16x1xf32> to vector<16x32xf32>
      %134 = arith.mulf %133, %132 : vector<16x32xf32>
      %135 = arith.mulf %134, %132 : vector<16x32xf32>
      %cst_52 = arith.constant dense<0.000000e+00> : vector<32xf32>
      %136 = vector.multi_reduction <add>, %135, %cst_52 [0] : vector<16x32xf32> to vector<32xf32>
      %137 = vector.shape_cast %136 : vector<32xf32> to vector<1x32xf32>
      %cst_53 = arith.constant 9.99999974E-6 : f32
      %138 = vector.broadcast %cst_53 : f32 to vector<1x32xf32>
      %139 = arith.addf %137, %138 : vector<1x32xf32>
      %140 = math.rsqrt %139 : vector<1x32xf32>
      %141 = vector.broadcast %140 : vector<1x32xf32> to vector<16x32xf32>
      %142 = arith.mulf %132, %141 : vector<16x32xf32>
      %143 = arith.index_cast %arg20 : i32 to index
      %c0_54 = arith.constant 0 : index
      %c0_55 = arith.constant 0 : index
      %144 = vector.load %arg12[%143, %c0_54, %c0_55] : memref<2x1x32xf32, #tpu.memory_space<vmem>>, vector<1x1x32xf32>
      %145 = vector.shape_cast %144 : vector<1x1x32xf32> to vector<1x32xf32>
      %146 = arith.index_cast %arg20 : i32 to index
      %c0_56 = arith.constant 0 : index
      %c0_57 = arith.constant 0 : index
      %147 = vector.load %arg13[%146, %c0_56, %c0_57] : memref<2x1x32xf32, #tpu.memory_space<vmem>>, vector<1x1x32xf32>
      %148 = vector.shape_cast %147 : vector<1x1x32xf32> to vector<1x32xf32>
      %cst_58 = arith.constant dense<0.000000e+00> : vector<32xf32>
      %149 = vector.multi_reduction <add>, %142, %cst_58 [0] : vector<16x32xf32> to vector<32xf32>
      %150 = vector.shape_cast %149 : vector<32xf32> to vector<1x32xf32>
      %151 = arith.mulf %142, %142 : vector<16x32xf32>
      %cst_59 = arith.constant dense<0.000000e+00> : vector<32xf32>
      %152 = vector.multi_reduction <add>, %151, %cst_59 [0] : vector<16x32xf32> to vector<32xf32>
      %153 = vector.shape_cast %152 : vector<32xf32> to vector<1x32xf32>
      %154 = tpu.concatenate %150, %153 in 0 : vector<1x32xf32>, vector<1x32xf32> -> vector<2x32xf32>
      %cst_60 = arith.constant dense<0.000000e+00> : vector<2x32xf32>
      %155 = tpu.matmul %154, %7, %cst_60 {dimension_numbers = #tpu.dot_dimension_numbers<[1], [0], [0], [1], [0, 0, 1, 1], [], []>} : vector<2x32xf32>, vector<32x32xf32>, vector<2x32xf32> -> vector<2x32xf32>
      %156 = vector.extract_strided_slice %155 {offsets = [0, 0], sizes = [1, 32], strides = [1, 1]} : vector<2x32xf32> to vector<1x32xf32>
      %157 = vector.extract_strided_slice %155 {offsets = [1, 0], sizes = [1, 32], strides = [1, 1]} : vector<2x32xf32> to vector<1x32xf32>
      %158 = arith.mulf %156, %156 : vector<1x32xf32>
      %159 = arith.subf %157, %158 : vector<1x32xf32>
      %cst_61 = arith.constant 0.000000e+00 : f32
      %160 = vector.broadcast %cst_61 : f32 to vector<1x32xf32>
      %161 = arith.maximumf %159, %160 : vector<1x32xf32>
      %cst_62 = arith.constant 9.99999974E-6 : f32
      %162 = vector.broadcast %cst_62 : f32 to vector<1x32xf32>
      %163 = arith.addf %161, %162 : vector<1x32xf32>
      %164 = math.rsqrt %163 : vector<1x32xf32>
      %165 = arith.mulf %164, %145 : vector<1x32xf32>
      %166 = arith.mulf %156, %165 : vector<1x32xf32>
      %167 = arith.subf %148, %166 : vector<1x32xf32>
      %168 = vector.broadcast %165 : vector<1x32xf32> to vector<16x32xf32>
      %169 = arith.mulf %142, %168 : vector<16x32xf32>
      %170 = vector.broadcast %167 : vector<1x32xf32> to vector<16x32xf32>
      %171 = arith.addf %169, %170 : vector<16x32xf32>
      %cst_63 = arith.constant 0.000000e+00 : f32
      %172 = vector.broadcast %cst_63 : f32 to vector<16x32xf32>
      %173 = arith.maximumf %171, %172 : vector<16x32xf32>
      %174 = arith.truncf %173 : vector<16x32xf32> to vector<16x32xbf16>
      %175 = arith.index_cast %arg20 : i32 to index
      %c0_64 = arith.constant 0 : index
      %c0_65 = arith.constant 0 : index
      %176 = vector.load %arg14[%175, %c0_64, %c0_65] : memref<2x32x32xbf16, #tpu.memory_space<vmem>>, vector<1x32x32xbf16>
      %177 = vector.shape_cast %176 : vector<1x32x32xbf16> to vector<32x32xbf16>
      %cst_66 = arith.constant dense<0.000000e+00> : vector<16x32xf32>
      %178 = tpu.matmul %174, %177, %cst_66 {dimension_numbers = #tpu.dot_dimension_numbers<[1], [0], [0], [1], [0, 0, 1, 1], [], []>} : vector<16x32xbf16>, vector<32x32xbf16>, vector<16x32xf32> -> vector<16x32xf32>
      %179 = arith.index_cast %arg20 : i32 to index
      %c0_67 = arith.constant 0 : index
      %c0_68 = arith.constant 0 : index
      %180 = vector.load %arg15[%179, %c0_67, %c0_68] : memref<2x1x32xf32, #tpu.memory_space<vmem>>, vector<1x1x32xf32>
      %181 = vector.shape_cast %180 : vector<1x1x32xf32> to vector<1x32xf32>
      %182 = vector.broadcast %181 : vector<1x32xf32> to vector<16x32xf32>
      %183 = arith.addf %178, %182 : vector<16x32xf32>
      %184 = arith.addf %arg21, %183 : vector<16x32xf32>
      scf.yield %184 : vector<16x32xf32>
    }
    %c2_i32_8 = arith.constant 2 : i32
    %c0_9 = arith.constant 0 : index
    %c0_10 = arith.constant 0 : index
    %10 = vector.load %arg17[%c0_9, %c0_10] : memref<1x32xf32, #tpu.memory_space<vmem>>, vector<1x32xf32>
    %cst_11 = arith.constant dense<0.000000e+00> : vector<1x16xf32>
    %11 = tpu.matmul %10, %9, %cst_11 {dimension_numbers = #tpu.dot_dimension_numbers<[1], [1], [0], [0], [0, 0, 1, 0], [], []>} : vector<1x32xf32>, vector<16x32xf32>, vector<1x16xf32> -> vector<1x16xf32>
    %c0_12 = arith.constant 0 : index
    %c0_13 = arith.constant 0 : index
    %12 = vector.load %arg18[%c0_12, %c0_13] : memref<1x1xf32, #tpu.memory_space<vmem>>, vector<1x1xf32>
    %13 = vector.broadcast %12 : vector<1x1xf32> to vector<1x16xf32>
    %14 = arith.addf %11, %13 : vector<1x16xf32>
    %c0_14 = arith.constant 0 : index
    %c0_15 = arith.constant 0 : index
    %c0_16 = arith.constant 0 : index
    %15 = vector.load %arg19[%c0_14, %c0_15, %c0_16] : memref<1x1x16xf32, #tpu.memory_space<vmem>>, vector<1x1x16xf32>
    %16 = vector.shape_cast %15 : vector<1x1x16xf32> to vector<1x16xf32>
    %17 = vector.shape_cast %14 : vector<1x16xf32> to vector<1x1x16xf32>
    tpu.vector_store %arg19[%c0_14, %c0_15, %c0_16], %17 {strides = array<i32>} : memref<1x1x16xf32, #tpu.memory_space<vmem>>, vector<1x1x16xf32>,
    return
  }
  func.func @transform_0(%arg0: i32) -> (i32, i32, i32) {
    %c0_i32 = arith.constant 0 : i32
    %c0_i32_0 = arith.constant 0 : i32
    %c0_i32_1 = arith.constant 0 : i32
    return %arg0, %c0_i32, %c0_i32_0 : i32, i32, i32
  }
  func.func @transform_1(%arg0: i32) -> (i32, i32) {
    %c0_i32 = arith.constant 0 : i32
    %c0_i32_0 = arith.constant 0 : i32
    %c0_i32_1 = arith.constant 0 : i32
    return %c0_i32, %c0_i32_0 : i32, i32
  }
  func.func @transform_2(%arg0: i32) -> (i32, i32) {
    %c0_i32 = arith.constant 0 : i32
    %c0_i32_0 = arith.constant 0 : i32
    %c0_i32_1 = arith.constant 0 : i32
    return %c0_i32, %c0_i32_0 : i32, i32
  }
  func.func @transform_3(%arg0: i32) -> (i32, i32, i32) {
    %c0_i32 = arith.constant 0 : i32
    %c0_i32_0 = arith.constant 0 : i32
    %c0_i32_1 = arith.constant 0 : i32
    %c0_i32_2 = arith.constant 0 : i32
    return %c0_i32, %c0_i32_0, %c0_i32_1 : i32, i32, i32
  }
  func.func @transform_4(%arg0: i32) -> (i32, i32, i32) {
    %c0_i32 = arith.constant 0 : i32
    %c0_i32_0 = arith.constant 0 : i32
    %c0_i32_1 = arith.constant 0 : i32
    %c0_i32_2 = arith.constant 0 : i32
    return %c0_i32, %c0_i32_0, %c0_i32_1 : i32, i32, i32
  }
  func.func @transform_5(%arg0: i32) -> (i32, i32, i32) {
    %c0_i32 = arith.constant 0 : i32
    %c0_i32_0 = arith.constant 0 : i32
    %c0_i32_1 = arith.constant 0 : i32
    %c0_i32_2 = arith.constant 0 : i32
    return %c0_i32, %c0_i32_0, %c0_i32_1 : i32, i32, i32
  }
  func.func @transform_6(%arg0: i32) -> (i32, i32, i32) {
    %c0_i32 = arith.constant 0 : i32
    %c0_i32_0 = arith.constant 0 : i32
    %c0_i32_1 = arith.constant 0 : i32
    %c0_i32_2 = arith.constant 0 : i32
    return %c0_i32, %c0_i32_0, %c0_i32_1 : i32, i32, i32
  }
  func.func @transform_7(%arg0: i32) -> (i32, i32, i32) {
    %c0_i32 = arith.constant 0 : i32
    %c0_i32_0 = arith.constant 0 : i32
    %c0_i32_1 = arith.constant 0 : i32
    %c0_i32_2 = arith.constant 0 : i32
    return %c0_i32, %c0_i32_0, %c0_i32_1 : i32, i32, i32
  }
  func.func @transform_8(%arg0: i32) -> (i32, i32, i32) {
    %c0_i32 = arith.constant 0 : i32
    %c0_i32_0 = arith.constant 0 : i32
    %c0_i32_1 = arith.constant 0 : i32
    %c0_i32_2 = arith.constant 0 : i32
    return %c0_i32, %c0_i32_0, %c0_i32_1 : i32, i32, i32
  }
  func.func @transform_9(%arg0: i32) -> (i32, i32, i32) {
    %c0_i32 = arith.constant 0 : i32
    %c0_i32_0 = arith.constant 0 : i32
    %c0_i32_1 = arith.constant 0 : i32
    %c0_i32_2 = arith.constant 0 : i32
    return %c0_i32, %c0_i32_0, %c0_i32_1 : i32, i32, i32
  }
  func.func @transform_10(%arg0: i32) -> (i32, i32, i32) {
    %c0_i32 = arith.constant 0 : i32
    %c0_i32_0 = arith.constant 0 : i32
    %c0_i32_1 = arith.constant 0 : i32
    %c0_i32_2 = arith.constant 0 : i32
    return %c0_i32, %c0_i32_0, %c0_i32_1 : i32, i32, i32
  }
  func.func @transform_11(%arg0: i32) -> (i32, i32, i32) {
    %c0_i32 = arith.constant 0 : i32
    %c0_i32_0 = arith.constant 0 : i32
    %c0_i32_1 = arith.constant 0 : i32
    %c0_i32_2 = arith.constant 0 : i32
    return %c0_i32, %c0_i32_0, %c0_i32_1 : i32, i32, i32
  }
  func.func @transform_12(%arg0: i32) -> (i32, i32, i32) {
    %c0_i32 = arith.constant 0 : i32
    %c0_i32_0 = arith.constant 0 : i32
    %c0_i32_1 = arith.constant 0 : i32
    %c0_i32_2 = arith.constant 0 : i32
    return %c0_i32, %c0_i32_0, %c0_i32_1 : i32, i32, i32
  }
  func.func @transform_13(%arg0: i32) -> (i32, i32, i32) {
    %c0_i32 = arith.constant 0 : i32
    %c0_i32_0 = arith.constant 0 : i32
    %c0_i32_1 = arith.constant 0 : i32
    %c0_i32_2 = arith.constant 0 : i32
    return %c0_i32, %c0_i32_0, %c0_i32_1 : i32, i32, i32
  }
  func.func @transform_14(%arg0: i32) -> (i32, i32, i32) {
    %c0_i32 = arith.constant 0 : i32
    %c0_i32_0 = arith.constant 0 : i32
    %c0_i32_1 = arith.constant 0 : i32
    %c0_i32_2 = arith.constant 0 : i32
    return %c0_i32, %c0_i32_0, %c0_i32_1 : i32, i32, i32
  }
  func.func @transform_15(%arg0: i32) -> (i32, i32) {
    %c0_i32 = arith.constant 0 : i32
    %c0_i32_0 = arith.constant 0 : i32
    %c0_i32_1 = arith.constant 0 : i32
    return %c0_i32, %c0_i32_0 : i32, i32
  }
  func.func @transform_16(%arg0: i32) -> (i32, i32) {
    %c0_i32 = arith.constant 0 : i32
    %c0_i32_0 = arith.constant 0 : i32
    %c0_i32_1 = arith.constant 0 : i32
    return %c0_i32, %c0_i32_0 : i32, i32
  }
  func.func @transform_17(%arg0: i32) -> (i32, i32) {
    %c0_i32 = arith.constant 0 : i32
    %c0_i32_0 = arith.constant 0 : i32
    %c0_i32_1 = arith.constant 0 : i32
    return %c0_i32, %c0_i32_0 : i32, i32
  }
  func.func @transform_18(%arg0: i32) -> (i32, i32, i32) {
    %c0_i32 = arith.constant 0 : i32
    %c0_i32_0 = arith.constant 0 : i32
    %c0_i32_1 = arith.constant 0 : i32
    return %arg0, %c0_i32, %c0_i32_0 : i32, i32, i32
  }
}

</mosaic_0001>

<bundles_post_ra>
// kernel: lmc_forward.2
= control target key start
LH: loop header
LB: loop body
LE: loop exit
PB: predicated region body
PF: predicated region fallthrough
CT: control target
= control target key end

     0   :  { %s516_s18 = smov 0   ;;  %s553_s0 = inlined_call_operand.vmem [shape: f32[2,16,4], index: 0, kind: input, shape index: {}]   ;;  %s554_s1 = inlined_call_operand.vmem [shape: f32[4,8], index: 1, kind: input, shape index: {}]   ;;  %s555_s2 = inlined_call_operand.vmem [shape: f32[1,8], index: 2, kind: input, shape index: {}]   ;;  %s556_s3 = inlined_call_operand.vmem [shape: f32[1,8], index: 3, kind: input, shape index: {}]   ;;  %s557_s4 = inlined_call_operand.vmem [shape: f32[1,8], index: 4, kind: input, shape index: {}]   ;;  %s558_s5 = inlined_call_operand.vmem [shape: bf16[2,16,8], index: 5, kind: output, shape index: {}]  }
   0x1 LB: > { %s437_s19 = sadd.s32 4294967295, %s484_s18   ;;  %p441_p0 = scmp.ge.s32.totalorder %s484_s18, 1  ;;  %s484_s18 = sphi %s516_s18, %s15_s18  }
   0x2   : > { %p187_p1 = scmp.lt.s32.totalorder %s484_s18, 3 }
   0x4   : > { %p188_p2 = pnand %p441_p0, %p187_p1 }
   0x5   : > { %p215_p3 = scmp.lt.s32.totalorder (!%p188_p2), %s437_s19, 1 }
   0x6   : > { %191 = sbr.rel (%p188_p2) target bundleno = 278 (0x116), region = 40 }
   0xb   : > { %v227_v0 = vld [vmem:[%s554_s1] sm:$0xf]  ;;  %vm242_vm0 = vcmask 1043456   ;;  %s560_s19 = smov (!%p215_p3, %s437_s19), 1  ;;  %vm235_vm1 = vcmask 31744   ;;  %vm321_vm2 = vcmask 64512  }
   0xc   : > { %463 = vmatprep.subr.msk.mxu0 %vm242_vm0, %v227_v0  ;;  %s456_s22 = sshll.u32 %s560_s19, 4  ;;  %v446_v3 = vld [vmem:[%s555_s2] ss:$0 sm:$0xff]  ;;  %s457_s7 = sshll.u32 %s560_s19, 3  ;;  %vm379_vm3 = vcmask 60416  }
   0xd   : > { %464 = vmatpush3.msk.msra.mxu0 %vm242_vm0, %v227_v0  ;;  %s219_s25 = scalar_lea.vmem %s553_s0, %s456_s22  ;;  %v450_v34 = vld [vmem:[%s556_s3] ss:$0 sm:$0xff]  ;;  %s224_s10 = scalar_lea.vmem %s558_s5, %s457_s7 }
   0xe   : > { %v225_v1 = vld [vmem:[%s219_s25] sm:$0xff]  ;;  %v226_v2 = vld [vmem:[%s219_s25 + $0x8] sm:$0xff] }
   0xf   : > { %465 = vmatprep.mubr.msk.f32.mxu0 %vm235_vm1, %v225_v1  ;;  %v451_v37 = vld [vmem:[%s557_s4] ss:$0 sm:$0xff] }
  0x10   : > { %466 = vmatmul.mubr.msk.f32.vlgmr.msra.gmra.mxu0 %vm235_vm1, %v226_v2 }
  0xd0   : > { %v467_v4 = vpop.f32.mrf.mxu0 }
  0xd1   : > { %v318_v5 = vadd.f32 %v467_v4, %v446_v3 }
  0xd2   : > { %v312_v6 = vpop.f32.mrf.mxu0 }
  0xd3   : > { %v313_v7 = vadd.f32 %v446_v3, %v312_v6  ;;  %v323_v8 = vsel %vm321_vm2, %v318_v5, 0.0 }
  0xd5   : > { %v322_v9 = vsel %vm321_vm2, %v313_v7, 0.0 }
  0xd6   : > { %v324_v10 = vadd.f32 %v323_v8, %v322_v9 }
  0xd8   : > { %v325_v11 = vrot.slane %v324_v10, 4 }
  0xda   : > { %v326_v12 = vadd.f32 %v325_v11, %v324_v10 }
  0xdc   : > { %v327_v13 = vrot.slane %v326_v12, 2 }
  0xde   : > { %v328_v14 = vadd.f32 %v327_v13, %v326_v12 }
  0xe0   : > { %v329_v15 = vrot.slane %v328_v14, 1 }
  0xe2   : > { %v330_v16 = vadd.f32 %v329_v15, %v328_v14 }
  0xe4   : > { %v332_v17 = vmul.f32 0.0625, %v330_v16 }
  0xe6   : > { %v333_v18 = vsub.f32 %v313_v7, %v332_v17  ;;  %v334_v19 = vsub.f32 %v318_v5, %v332_v17 }
  0xe8   : > { %v335_v20 = vmul.f32 %v333_v18, %v333_v18  ;;  %v336_v21 = vmul.f32 %v334_v19, %v334_v19 }
  0xea   : > { %v337_v22 = vsel %vm321_vm2, %v335_v20, 0.0  ;;  %v338_v23 = vsel %vm321_vm2, %v336_v21, 0.0 }
  0xeb   : > { %v339_v24 = vadd.f32 %v338_v23, %v337_v22 }
  0xed   : > { %v340_v25 = vrot.slane %v339_v24, 4 }
  0xef   : > { %v341_v26 = vadd.f32 %v340_v25, %v339_v24 }
  0xf1   : > { %v342_v27 = vrot.slane %v341_v26, 2 }
  0xf3   : > { %v343_v28 = vadd.f32 %v342_v27, %v341_v26 }
  0xf5   : > { %v344_v29 = vrot.slane %v343_v28, 1 }
  0xf7   : > { %v345_v30 = vadd.f32 %v344_v29, %v343_v28 }
  0xf9   : > { %v346_v31 = vmul.f32 0.0625, %v345_v30 }
  0xfb   : > { %v347_v32 = vadd.f32 1e-05, %v346_v31 }
  0xfd   : > { %476 = vrsqrt.f32 %v347_v32 }
 0x10a   : > { %v477_v33 = vpop.eup %476 }
 0x10b   : > { %v349_v35 = vmul.f32 %v477_v33, %v333_v18  ;;  %v350_v36 = vmul.f32 %v477_v33, %v334_v19 }
 0x10d   : > { %v358_v38 = vmul.f32 %v450_v34, %v349_v35  ;;  %v359_v39 = vmul.f32 %v450_v34, %v350_v36 }
 0x10f   : > { %v367_v40 = vadd.f32 %v451_v37, %v358_v38  ;;  %v368_v41 = vadd.f32 %v451_v37, %v359_v39 }
 0x111   : > { %v369_v42 = vmax.f32 %v367_v40, 0.0  ;;  %v370_v43 = vmax.f32 %v368_v41, 0.0 }
 0x113   : > { %v458_v44 = vpack.c.bf16 %v369_v42, %v369_v42  ;;  %v459_v45 = vpack.c.bf16 %v370_v43, %v370_v43 }
 0x115   : > { %380 = vst.msk [vmem:[%s224_s10] sm:$0xf] %vm379_vm3, %v458_v44  ;;  %381 = vst.msk [vmem:[%s224_s10 + $0x4] sm:$0xf] %vm379_vm3, %v459_v45 }
 0x116 PF: > { %s15_s18 = sadd.s32 1, %s484_s18  }
 0x117   : > { %p12_p4 = scmp.ge.s32.totalorder %s15_s18, 4  }
 0x119   :  { %14 = sbr.rel (!%p12_p4) target bundleno = 1 (0x1), region = 70 }

// kernel: lmc_forward.3
= control target key start
LH: loop header
LB: loop body
LE: loop exit
PB: predicated region body
PF: predicated region fallthrough
CT: control target
= control target key end

     0   :  { %s2455_s0 = inlined_call_operand.vmem [shape: bf16[2,16,64], index: 0, kind: input, shape index: {}]   ;;  %s2456_s1 = inlined_call_operand.vmem [shape: bf16[64,32], index: 1, kind: input, shape index: {}]   ;;  %s2457_s2 = inlined_call_operand.vmem [shape: f32[1,32], index: 2, kind: input, shape index: {}]   ;;  %s2458_s3 = inlined_call_operand.vmem [shape: f32[2,32,2], index: 3, kind: input, shape index: {}]   ;;  %s2459_s4 = inlined_call_operand.vmem [shape: f32[2,1,2], index: 4, kind: input, shape index: {}]   ;;  %s2460_s5 = inlined_call_operand.vmem [shape: f32[2,1,32], index: 5, kind: input, shape index: {}]   ;;  %s2461_s6 = inlined_call_operand.vmem [shape: f32[2,1,32], index: 6, kind: input, shape index: {}]   ;;  %s2462_s7 = inlined_call_operand.vmem [shape: bf16[2,32,32], index: 7, kind: input, shape index: {}]   ;;  %s2463_s8 = inlined_call_operand.vmem [shape: f32[2,1,32], index: 8, kind: input, shape index: {}]   ;;  %s2464_s9 = inlined_call_operand.vmem [shape: f32[2,32,2], index: 9, kind: input, shape index: {}]   ;;  %s2465_s10 = inlined_call_operand.vmem [shape: f32[2,1,2], index: 10, kind: input, shape index: {}]   ;;  %s2466_s11 = inlined_call_operand.vmem [shape: f32[2,1,32], index: 11, kind: input, shape index: {}]   ;;  %s2467_s12 = inlined_call_operand.vmem [shape: f32[2,1,32], index: 12, kind: input, shape index: {}]   ;;  %s2468_s13 = inlined_call_operand.vmem [shape: bf16[2,32,32], index: 13, kind: input, shape index: {}]   ;;  %s2469_s14 = inlined_call_operand.vmem [shape: f32[2,1,32], index: 14, kind: input, shape index: {}]   ;;  %s2470_s15 = inlined_call_operand.vmem [shape: f32[32,32], index: 15, kind: input, shape index: {}]   ;;  %s2471_s16 = inlined_call_operand.vmem [shape: f32[1,32], index: 16, kind: input, shape index: {}]   ;;  %s2472_s17 = inlined_call_operand.<no memory space> [shape: f32[1,1], index: 17, kind: input, shape index: {}]   ;;  %s2473_s18 = inlined_call_operand.hbm [shape: f32[2,1,16], index: 18, kind: output, shape index: {}]  }
   0x1   :  { %2481 = sst [smem:[#allocation10_spill]] %s2455_s0  ;;  %v23_v0 = vstv %s2472_s17 }
   0x2   :  { %2482 = sst [smem:[#allocation11_spill]] %s2456_s1  ;;  %24 = vst [vmem:[#allocation2] sm:$0x1] %v23_v0 }
   0x3   :  { %2483 = sst [smem:[#allocation12_spill]] %s2457_s2 }
   0x4   :  { %2484 = sst [smem:[#allocation13_spill]] %s2458_s3 }
   0x5   :  { %25 = vsyncpa [#allocation4], 0 }
   0x6   :  { %27 = vsyncpa [#allocation4 + $0x1], 0  ;;  %s2124_s29 = smov 0   ;;  %s2126_s30 = smov 0  }
   0x7   :  { %s2128_s0 = smov 0   ;;  %s2130_s19 = smov 0  }
   0x8 LB: > { %2485 = sst [smem:[#allocation6_spill]] %s2000_s0  ;;  %s2145_s17 = sadd.s32 4294967295, %s2004_s19   ;;  %s2004_s19 = sphi %s2130_s19, %s2501_s19   ;;  %s2000_s0 = sphi %s2128_s0, %s2503_s0   ;;  %s1996_s30 = sphi %s2126_s30, %s2505_s30   ;;  %s1992_s29 = sphi %s2124_s29, %s2504_s29  }
   0x9   : > { %s1651_s1 = sadd.s32 4294967294, %s2004_s19   ;;  %s2149_s20 = sadd.s32 1, %s2004_s19  }
   0xa   : > { %2486 = sst [smem:[#allocation7_spill]] %s2149_s20  ;;  %s423_s21 = sadd.s32 1, %s2000_s0 }
   0xb   : > { %s420_s22 = ssub.s32 %s2004_s19, %s2149_s20  ;;  %p433_p0 = scmp.ne.s32.totalorder %s2000_s0, %s1996_s30 }
   0xc   : > { %p421_p1 = scmp.eq.s32.totalorder %s420_s22, 0  ;;  %p434_p2 = scmp.eq.s32.totalorder %s2145_s17, 1 }
   0xd   : > { %p439_p3 = scmp.ne.s32.totalorder %s1996_s30, %s1992_s29  ;;  %p440_p4 = scmp.eq.s32.totalorder %s1651_s1, 1 }
   0xe   : > { %s2160_s2 = scalar_select %p421_p1, %s2000_s0, %s423_s21  }
   0xf   : > { %p2162_p5 = por %p434_p2, %p433_p0  ;;  %p2166_p6 = por %p440_p4, %p439_p3 }
  0x10   : > { %2487 = sst [smem:[#allocation8_spill]] %s2160_s2  ;;  %p1654_p7 = scmp.ge.s32.totalorder %s2004_s19, 1 }
  0x11   : > { %s2489_s24 = scalar_select %p2166_p6, 1, 0 }
  0x12   : > { %p517_p8 = scmp.lt.s32.totalorder %s2004_s19, 3 }
  0x13   : > { %2490 = sst [smem:[#allocation9_spill]] %s2489_s24 }
  0x14   : > { %p518_p9 = pnand %p1654_p7, %p517_p8 }
  0x15   : > { %s2491_s28 = sld [smem:[#allocation11_spill]] (!%p518_p9)  ;;  %p570_p10 = scmp.lt.s32.totalorder (!%p518_p9), %s2145_s17, 1 }
  0x16   : > { %521 = sbr.rel (%p518_p9) target bundleno = 2501 (0x9c5), region = 92  ;;  %s2492_s1 = sld [smem:[#allocation10_spill]] (!%p518_p9) }
  0x17   : > { %s2493_s2 = sld [smem:[#allocation12_spill]] (!%p518_p9)  ;;  %s2494_s25 = sand.u32 (!%p518_p9), 1, %s1996_s30  }
  0x18   : > { %s2227_s0 = smov (!%p518_p9), 0  }
  0x1b   : > { %v2018_v1 = vmov 0.0   ;;  %v1884_v2 = vld [vmem:[%s2491_s28 + $0x18] sm:$0xff]   ;;  %v1885_v3 = vld [vmem:[%s2491_s28 + $0x10] sm:$0xff]   ;;  %vm2019_vm0 = vmmov 0   ;;  %s571_s22 = scalar_select %p570_p10, %s2145_s17, 1  ;;  %v1886_v4 = vld [vmem:[%s2491_s28 + $0x8] sm:$0xff]  }
  0x1c   : > { %1735 = vmatprep.subr.bf16.mxu0 %v2018_v1  ;;  %1743 = vmatprep.mubr.msk.bf16.mxu0 %vm2019_vm0, %v2018_v1  ;;  %v1887_v5 = vld [vmem:[%s2491_s28] sm:$0xff]   ;;  %vm622_vm1 = vcmask 523264   ;;  %v2204_v8 = vld [vmem:[%s2470_s15 + $0x8] sm:$0xff]  ;;  %v2209_v9 = vld [vmem:[%s2470_s15 + $0x10] sm:$0xff] }
  0x1d   : > { %1736 = vmatpush3.bf16.msra.mxu0 %v1884_v2  ;;  %s1696_s26 = sshll.u32 %s571_s22, 3  ;;  %v2199_v7 = vld [vmem:[%s2470_s15] sm:$0xff]  ;;  %v2214_v10 = vld [vmem:[%s2470_s15 + $0x18] sm:$0xff]  ;;  %s2221_s22 = scalar_lea.vmem [#allocation3], %s2494_s25 }
  0x1e   : > { %1737 = vmatprep.subr.bf16.mxu0 %v2018_v1  ;;  %s574_s21 = scalar_lea.vmem %s2492_s1, %s1696_s26  ;;  %v1657_v11 = vld [vmem:[%s2493_s2] ss:$0 sm:$0xff] }
  0x1f   : > { %v1888_v6 = vld [vmem:[%s574_s21] sm:$0xff]  }
  0x21   : > { %1738 = vmatpush3.bf16.msra.mxu0 %v1885_v3 }
  0x22   : > { %1739 = vmatprep.subr.bf16.mxu0 %v2018_v1 }
  0x25   : > { %1740 = vmatpush3.bf16.msra.mxu0 %v1886_v4 }
  0x26   : > { %1741 = vmatprep.subr.bf16.mxu0 %v2018_v1 }
  0x29   : > { %1742 = vmatpush3.bf16.msra.mxu0 %v1887_v5 }
  0x2c   : > { %1744 = vmatmul.mubr.msk.bf16.vlgmr.msra.gmra.mxu0 %vm622_vm1, %v1888_v6 }
  0xec   : > { %v660_v12 = vpop.f32.mrf.mxu0 }
  0xed   : > { %v661_v13 = vadd.f32 %v1657_v11, %v660_v12  }
  0xee   : > { %v1745_v14 = vpop.f32.mrf.mxu0 }
  0xf0   : > { %v663_v15 = vpop.f32.mrf.mxu0 }
  0xf1   : > { %v664_v16 = vadd.f32 %v1657_v11, %v663_v15  }
  0xf2   : > { %v1746_v17 = vpop.f32.mrf.mxu0 }
  0xf3 LB: >> { %vm693_vm2 = vcmask 261120   ;;  %s1664_s26 = sshll.u32 %s2016_s0, 5  ;;  %s2495_s3 = sld [smem:[#allocation13_spill]]  ;;  %vm787_vm3 = vcmask 15368   ;;  %v2021_v42 = vmov 0   ;;  %vm813_vm4 = vcmask 7168   ;;  %s2016_s0 = sphi %s2227_s0, %s676_s0   ;;  %v2012_v13 = vphi %v661_v13, %v2498_v13   ;;  %v2008_v16 = vphi %v664_v16, %v2497_v16  }
  0xf4   : >> { %1755 = vmatprep.mubr.msk.f32.mxu0 %vm693_vm2, %v2012_v13  ;;  %s685_s2 = scalar_lea.vmem %s2459_s4, %s2016_s0  ;;  %s2479_s25 = smov 127   ;;  %1889 = vset.pattern.permute.xlu1 %v2021_v42  ;;  %v2022_v4 = vmov 0.0   ;;  %vm2023_vm5 = vmmov 0   ;;  %vm890_vm6 = vcmask 1040384  }
  0xf5   : >> { %v1665_v22 = vld [vmem:[%s685_s2] ss:$0 sm:$0xff]  ;;  %1890 = vset.pattern.permute.xlu0 %v2021_v42  ;;  %1758 = vmatprep.subr.mxu1 %v2022_v4  ;;  %s1697_s20 = sshll.u32 %s2016_s0, 4  ;;  %s868_s2 = scalar_lea.vmem %s2461_s6, %s2016_s0 }
  0xf6   : >> { %1766 = vmatprep.mubr.msk.f32.mxu1 %vm2023_vm5, %v2022_v4  ;;  %1759 = vmatpush3.msra.mxu1 %v2214_v10  ;;  %s1004_s1 = scalar_lea.vmem %s2462_s7, %s1697_s20  ;;  %s1078_s21 = scalar_lea.vmem %s2465_s10, %s2016_s0 }
  0xf7   : >> { %1760 = vmatprep.subr.mxu1 %v2022_v4  ;;  %s1258_s24 = scalar_lea.vmem %s2467_s12, %s2016_s0 }
  0xf8   : >> { %1761 = vmatpush3.msra.mxu1 %v2209_v9 }
  0xf9   : >> { %s680_s27 = scalar_lea.vmem %s2495_s3, %s1664_s26  ;;  %1762 = vmatprep.subr.mxu1 %v2022_v4 }
  0xfa   : >> { %v684_v18 = vld [vmem:[%s680_s27 + $0x18] sm:$0xff]  ;;  %v683_v19 = vld [vmem:[%s680_s27 + $0x10] sm:$0xff]  ;;  %v682_v20 = vld [vmem:[%s680_s27 + $0x8] sm:$0xff]  ;;  %1763 = vmatpush3.msra.mxu1 %v2204_v8 }
  0xfb   : >> { %1747 = vmatprep.subr.mxu0 %v684_v18  ;;  %v681_v21 = vld [vmem:[%s680_s27] sm:$0xff]  ;;  %1764 = vmatprep.subr.mxu1 %v2022_v4 }
  0xfc   : >> { %1748 = vmatpush3.msra.mxu0 %v684_v18  ;;  %1765 = vmatpush3.msra.mxu1 %v2199_v7 }
  0xfd   : >> { %1749 = vmatprep.subr.mxu0 %v683_v19 }
  0xfe   : >> { %1750 = vmatpush3.msra.mxu0 %v683_v19 }
  0xff   : >> { %1751 = vmatprep.subr.mxu0 %v682_v20 }
 0x100   : >> { %1752 = vmatpush3.msra.mxu0 %v682_v20 }
 0x101   : >> { %1753 = vmatprep.subr.mxu0 %v681_v21 }
 0x102   : >> { %1754 = vmatpush3.msra.mxu0 %v681_v21 }
 0x103   : >> { %1756 = vmatmul.mubr.msk.f32.vlgmr.msra.gmra.mxu0 %vm693_vm2, %v2008_v16  ;;  %1769 = vmatprep.subr.bf16.mxu0 %v2022_v4 }
 0x104   : >> { %1773 = vmatprep.mubr.msk.bf16.mxu0 %vm2023_vm5, %v2022_v4 }
 0x1c3   : >> { %v1757_v23 = vpop.f32.mrf.mxu0 }
 0x1c4   : >> { %v772_v24 = vadd.f32 %v1757_v23, %v1665_v22 }
 0x1c5   : >> { %v766_v25 = vpop.f32.mrf.mxu0 }
 0x1c6   : >> { %v767_v26 = vadd.f32 %v1665_v22, %v766_v25  ;;  %v789_v27 = vsel %vm787_vm3, %v772_v24, -inf  ;;  %v1669_v44 = vmul.f32 -1.442695, %v772_v24 }
 0x1c8   : >> { %v788_v28 = vsel %vm787_vm3, %v767_v26, -inf  ;;  %v1668_v43 = vmul.f32 -1.442695, %v767_v26 }
 0x1c9   : >> { %v790_v29 = vmax.f32 %v788_v28, %v789_v27 }
 0x1cb   : >> { %v791_v30 = vrot.slane %v790_v29, 4 }
 0x1cd   : >> { %v792_v31 = vmax.f32 %v790_v29, %v791_v30 }
 0x1cf   : >> { %v793_v32 = vrot.slane %v792_v31, 2 }
 0x1d1   : >> { %v794_v33 = vmax.f32 %v792_v31, %v793_v32 }
 0x1d3   : >> { %v795_v34 = vrot.slane %v794_v33, 1 }
 0x1d5   : >> { %v796_v35 = vmax.f32 %v794_v33, %v795_v34 }
 0x1d7   : >> { %v797_v36 = vsub.f32 %v767_v26, %v796_v35  ;;  %v798_v37 = vsub.f32 %v772_v24, %v796_v35 }
 0x1d9   : >> { %v799_v38 = vmul.f32 1.442695, %v797_v36  ;;  %v801_v39 = vmul.f32 1.442695, %v798_v37 }
 0x1db   : >> { %1895 = vpow2.f32 %v799_v38 }
 0x1dc   : >> { %1897 = vpow2.f32 %v801_v39 }
 0x1dd   : >> { %1899 = vpow2.f32 %v1668_v43 }
 0x1de   : >> { %1901 = vpow2.f32 %v1669_v44 }
 0x1e8   : >> { %v1896_v40 = vpop.eup %1895 }
 0x1e9   : >> { %805 = vrot.lane.b32.xlu0 %v1896_v40, %s2479_s25  ;;  %v1898_v41 = vpop.eup %1897 }
 0x1ea   : >> { %v1900_v45 = vpop.eup %1899 }
 0x1eb   : >> { %v1902_v46 = vpop.eup %1901  ;;  %v781_v47 = vadd.f32 1.0, %v1900_v45 }
 0x1ec   : >> { %v782_v48 = vadd.f32 1.0, %v1902_v46 }
 0x1ed   : >> { %807 = vrot.lane.b32.xlu0 %v1898_v41, %s2479_s25  ;;  %1903 = vrcp.f32 %v781_v47  ;;  %s2298_s25 = scalar_lea.vmem %s2464_s9, %s1664_s26 }
 0x1ee   : >> { %1905 = vrcp.f32 %v782_v48 }
 0x1fa   : >> { %v1904_v50 = vpop.eup %1903 }
 0x1fb   : >> { %v1906_v52 = vpop.eup %1905 }
 0x25b   : >> { %v806_v49 = vpop.permute.xlu0 %805 }
 0x25c   : >> { %v811_v51 = vmul.f32 %v1904_v50, %v806_v49 }
 0x25e   : >> { %v814_v55 = vsel %vm813_vm4, %v811_v51, 0.0 }
 0x25f   : >> { %v808_v53 = vpop.permute.xlu0 %807 }
 0x260   : >> { %v812_v54 = vmul.f32 %v1906_v52, %v808_v53 }
 0x262   : >> { %v815_v56 = vsel %vm813_vm4, %v812_v54, 0.0 }
 0x263   : >> { %v816_v57 = vadd.f32 %v815_v56, %v814_v55 }
 0x265   : >> { %v817_v58 = vrot.slane %v816_v57, 4 }
 0x267   : >> { %v818_v59 = vadd.f32 %v817_v58, %v816_v57 }
 0x269   : >> { %v819_v60 = vrot.slane %v818_v59, 2 }
 0x26b   : >> { %v820_v61 = vadd.f32 %v819_v60, %v818_v59 }
 0x26d   : >> { %v821_v62 = vrot.slane %v820_v61, 1 }
 0x26f   : >> { %v822_v63 = vadd.f32 %v821_v62, %v820_v61 }
 0x271   : >> { %1907 = vrcp.f32 %v822_v63 }
 0x27e   : >> { %v1908_v0 = vpop.eup %1907 }
 0x27f   : >> { %v825_v2 = vmul.f32 %v1908_v0, %v812_v54  ;;  %v824_v3 = vmul.f32 %v1908_v0, %v811_v51  ;;  %v1891_v0 = vld [vmem:[%s1004_s1 + $0x8] sm:$0xff]  }
 0x280   : >> { %1770 = vmatpush3.bf16.msra.mxu0 %v1891_v0 }
 0x281   : >> { %828 = vperm.xlu1 %1889, %v824_v3   ;;  %1771 = vmatprep.subr.bf16.mxu0 %v2022_v4  ;;  %v1077_v3 = vld [vmem:[%s2298_s25 + $0x18] sm:$0xff] }
 0x282   : >> { %1777 = vmatprep.subr.mxu1 %v1077_v3 }
 0x285   : >> { %833 = vperm.xlu1 %1889, %v825_v2   ;;  %v1892_v2 = vld [vmem:[%s1004_s1] sm:$0xff]   ;;  %s866_s1 = scalar_lea.vmem %s2460_s5, %s2016_s0 }
 0x286   : >> { %1772 = vmatpush3.bf16.msra.mxu0 %v1892_v2 }
 0x287   : >> { %1788 = vmatprep.subr.mxu0 %v2022_v4 }
 0x2fc   : >> { %v829_v5 = vpop.permute.xlu1 %828 }
 0x2fd   : >> { %v836_v6 = vmul.f32 %v2012_v13, %v829_v5 }
 0x2ff   : >> { %v838_v14 = vsel %vm693_vm2, %v836_v6, 0.0 }
 0x300   : >> { %v834_v11 = vpop.permute.xlu1 %833 }
 0x301   : >> { %v837_v12 = vmul.f32 %v2008_v16, %v834_v11 }
 0x303   : >> { %v839_v15 = vsel %vm693_vm2, %v837_v12, 0.0 }
 0x304   : >> { %v840_v17 = vadd.f32 %v839_v15, %v838_v14 }
 0x306   : >> { %v841_v18 = vrot.slane %v840_v17, 4 }
 0x308   : >> { %v842_v19 = vadd.f32 %v841_v18, %v840_v17  ;;  %v985_v18 = vlaneseq }
 0x30a   : >> { %v843_v20 = vrot.slane %v842_v19, 2 }
 0x30c   : >> { %v844_v21 = vadd.f32 %v843_v20, %v842_v19  ;;  %v2305_v19 = vshrl.u32 %v985_v18, 7  ;;  %v1671_v20 = vld [vmem:[%s866_s1] ss:$0 sm:$0xff]  ;;  %s1009_s1 = scalar_lea.vmem %s2463_s8, %s2016_s0 }
 0x30e   : >> { %v845_v22 = vrot.slane %v844_v21, 1 }
 0x310   : >> { %v846_v23 = vadd.f32 %v845_v22, %v844_v21 }
 0x312   : >> { %v847_v24 = vsub.f32 %v2012_v13, %v846_v23  ;;  %v848_v25 = vsub.f32 %v2008_v16, %v846_v23  ;;  %v987_v23 = vsub.s32 1, %v2305_v19 }
 0x314   : >> { %v849_v26 = vmul.f32 %v847_v24, %v829_v5  ;;  %v850_v27 = vmul.f32 %v848_v25, %v834_v11 }
 0x316   : >> { %v851_v28 = vmul.f32 %v849_v26, %v847_v24  ;;  %v852_v29 = vmul.f32 %v850_v27, %v848_v25 }
 0x318   : >> { %v853_v30 = vsel %vm693_vm2, %v851_v28, 0.0  ;;  %v854_v31 = vsel %vm693_vm2, %v852_v29, 0.0  ;;  %v2315_v28 = vsub.s32 0, %v2305_v19 }
 0x319   : >> { %v855_v32 = vadd.f32 %v854_v31, %v853_v30 }
 0x31b   : >> { %v856_v33 = vrot.slane %v855_v32, 4 }
 0x31d   : >> { %v857_v34 = vadd.f32 %v856_v33, %v855_v32 }
 0x31f   : >> { %v858_v35 = vrot.slane %v857_v34, 2 }
 0x321   : >> { %v859_v36 = vadd.f32 %v858_v35, %v857_v34 }
 0x323   : >> { %v860_v37 = vrot.slane %v859_v36, 1 }
 0x325   : >> { %v861_v38 = vadd.f32 %v860_v37, %v859_v36 }
 0x327   : >> { %v862_v39 = vadd.f32 1e-05, %v861_v38  ;;  %v1076_v38 = vld [vmem:[%s2298_s25 + $0x10] sm:$0xff] }
 0x329   : >> { %1909 = vrsqrt.f32 %v862_v39  ;;  %v1075_v39 = vld [vmem:[%s2298_s25 + $0x8] sm:$0xff] }
 0x336   : >> { %v1910_v40 = vpop.eup %1909 }
 0x337   : >> { %v864_v41 = vmul.f32 %v1910_v40, %v847_v24  ;;  %v865_v42 = vmul.f32 %v1910_v40, %v848_v25  ;;  %v869_v25 = vld [vmem:[%s868_s2] sm:$0x1]  ;;  %s2496_s2 = smov 127  }
 0x338   : >> { %v1074_v40 = vld [vmem:[%s2298_s25] sm:$0xff]  ;;  %s1397_s25 = scalar_lea.vmem %s2469_s14, %s2016_s0 }
 0x339   : >> { %v880_v43 = vmul.f32 %v865_v42, %v865_v42  ;;  %v870_v44 = vsel %vm693_vm2, %v864_v41, 0.0  ;;  %v871_v45 = vsel %vm693_vm2, %v865_v42, 0.0  ;;  %v879_v46 = vmul.f32 %v864_v41, %v864_v41 }
 0x33a   : >> { %v872_v47 = vadd.f32 %v871_v45, %v870_v44 }
 0x33b   : >> { %v881_v48 = vsel %vm693_vm2, %v879_v46, 0.0  ;;  %v882_v49 = vsel %vm693_vm2, %v880_v43, 0.0 }
 0x33c   : >> { %v873_v50 = vrot.slane %v872_v47, 4  ;;  %v883_v51 = vadd.f32 %v882_v49, %v881_v48  ;;  %v1678_v48 = vld [vmem:[%s1078_s21] ss:$0 sm:$0xff]  ;;  %s1256_s21 = scalar_lea.vmem %s2466_s11, %s2016_s0  ;;  %s676_s0 = sadd.s32 1, %s2016_s0  }
 0x33d   : >> { %p673_p11 = scmp.ge.s32.totalorder %s676_s0, 2  }
 0x33e   : >> { %v874_v52 = vadd.f32 %v873_v50, %v872_v47  ;;  %v884_v53 = vrot.slane %v883_v51, 4  ;;  %vm1554_vm7 = vcmask (%p673_p11), 122880  }
 0x340   : >> { %v875_v54 = vrot.slane %v874_v52, 2  ;;  %v885_v55 = vadd.f32 %v884_v53, %v883_v51 }
 0x342   : >> { %v876_v56 = vadd.f32 %v875_v54, %v874_v52  ;;  %v886_v57 = vrot.slane %v885_v55, 2 }
 0x344   : >> { %v877_v58 = vrot.slane %v876_v56, 1  ;;  %v887_v59 = vadd.f32 %v886_v57, %v885_v55 }
 0x346   : >> { %v888_v60 = vrot.slane %v887_v59, 1  ;;  %v878_v61 = vadd.f32 %v877_v58, %v876_v56 }
 0x348   : >> { %v889_v62 = vadd.f32 %v888_v60, %v887_v59 }
 0x34a   : >> { %v891_v63 = vsel %vm890_vm6, %v878_v61, %v889_v62 }
 0x34b   : >> { %1767 = vmatmul.mubr.msk.f32.vlgmr.msra.gmra.mxu1 %vm693_vm2, %v891_v63 }
 0x34c   : >> { %1778 = vmatpush3.msra.mxu1 %v1077_v3 }
 0x34d   : >> { %1779 = vmatprep.subr.mxu1 %v1076_v38 }
 0x34e   : >> { %1780 = vmatpush3.msra.mxu1 %v1076_v38 }
 0x34f   : >> { %1781 = vmatprep.subr.mxu1 %v1075_v39 }
 0x350   : >> { %1782 = vmatpush3.msra.mxu1 %v1075_v39 }
 0x351   : >> { %1783 = vmatprep.subr.mxu1 %v1074_v40 }
 0x352   : >> { %1784 = vmatpush3.msra.mxu1 %v1074_v40 }
 0x353   : >> { %1799 = vmatprep.subr.bf16.mxu1 %v2022_v4 }
 0x40b   : >> { %v961_v5 = vpop.f32.mrf.mxu1 }
 0x40c   : >> { %v965_v6 = vmul.f32 %v961_v5, %v961_v5 }
 0x40d   : >> { %v1768_v11 = vpop.f32.mrf.mxu1 }
 0x40e   : >> { %v967_v12 = vrot.slane %v965_v6, 7 }
 0x410   : >> { %v969_v14 = vsub.f32 %v961_v5, %v967_v12 }
 0x412   : >> { %v970_v15 = vmax.f32 %v969_v14, 0.0 }
 0x414   : >> { %v971_v17 = vadd.f32 1e-05, %v970_v15 }
 0x416   : >> { %1911 = vrsqrt.f32 %v971_v17 }
 0x423   : >> { %v1912_v21 = vpop.eup %1911 }
 0x424   : >> { %v979_v22 = vmul.f32 %v1912_v21, %v1671_v20 }
 0x426   : >> { %v981_v24 = vrot.slane %v979_v22, 1  ;;  %v988_v27 = vrot.slane %v979_v22, %v987_v23 }
 0x428   : >> { %v983_v26 = vmul.f32 %v981_v24, %v961_v5  ;;  %v989_v30 = vmul.f32 %v988_v27, %v864_v41  ;;  %v990_v31 = vmul.f32 %v988_v27, %v865_v42  ;;  %v1674_v41 = vld [vmem:[%s1009_s1] ss:$0 sm:$0xff]  ;;  %s1392_s1 = scalar_lea.vmem %s2468_s13, %s1697_s20  ;;  %s1569_s20 = sshll.u32 (%p673_p11), %s2221_s22, 4  ;;  %s1570_s20 = int_to_ptr.vmem [resolvable:$true] %s1569_s20 }
 0x429   : > { %s1932_s0 = scalar_lea.vmem (%p673_p11), %s1570_s20, 16 }
 0x42a   : >> { %v984_v29 = vsub.f32 %v869_v25, %v983_v26  ;;  %p1933_p12 = scmp.ne.s32.totalorder (%p673_p11), %s1570_s20, %s1932_s0 }
 0x42c   : >> { %v995_v32 = vrot.slane %v984_v29, %v2315_v28  ;;  %p1934_p13 = pnand (%p673_p11), %p1933_p12, %p2162_p5 }
 0x42e   : >> { %v997_v33 = vadd.f32 %v995_v32, %v989_v30  ;;  %v998_v34 = vadd.f32 %v995_v32, %v990_v31  ;;  %p1935_p0 = pneg (%p673_p11), %p1934_p13 }
 0x430   : >> { %v999_v35 = vmax.f32 %v997_v33, 0.0  ;;  %v1000_v36 = vmax.f32 %v998_v34, 0.0 }
 0x432   : >> { %v1001_v37 = vpack.c.bf16 %v1000_v36, %v999_v35 }
 0x434   : >> { %1774 = vmatmul.mubr.msk.bf16.vlgmr.msra.gmra.mxu0 %vm693_vm2, %v1001_v37 }
 0x435   : >> { %1789 = vmatpush3.msra.mxu0 %v2214_v10  ;;  %1796 = vmatprep.mubr.msk.f32.mxu0 %vm2023_vm5, %v2022_v4 }
 0x436   : >> { %1790 = vmatprep.subr.mxu0 %v2022_v4 }
 0x437   : >> { %1791 = vmatpush3.msra.mxu0 %v2209_v9 }
 0x438   : >> { %1792 = vmatprep.subr.mxu0 %v2022_v4 }
 0x439   : >> { %1793 = vmatpush3.msra.mxu0 %v2204_v8 }
 0x43a   : >> { %1794 = vmatprep.subr.mxu0 %v2022_v4 }
 0x43b   : >> { %1795 = vmatpush3.msra.mxu0 %v2199_v7  ;;  %v1463_v7 = vld [vmem:[%s2471_s16] sm:$0x1] (%p673_p11) }
 0x43c   : > { %1807 = vmatprep.subr.mxu0 (%p673_p11), %v2018_v1 }
 0x4f4   : >> { %v1066_v42 = vpop.f32.mrf.mxu0 }
 0x4f5   : >> { %v2336_v43 = vadd.f32 %v1674_v41, %v1066_v42 }
 0x4f6   : >> { %v1775_v44 = vpop.f32.mrf.mxu0 }
 0x4f7   : >> { %1785 = vmatprep.mubr.msk.f32.mxu1 %vm693_vm2, %v2336_v43 }
 0x4f8   : >> { %v1069_v45 = vpop.f32.mrf.mxu0 }
 0x4f9   : >> { %v2340_v46 = vadd.f32 %v1674_v41, %v1069_v45 }
 0x4fa   : >> { %v1776_v47 = vpop.f32.mrf.mxu0 }
 0x4fb   : >> { %1786 = vmatmul.mubr.msk.f32.vlgmr.msra.gmra.mxu1 %vm693_vm2, %v2340_v46 }
 0x4fc   : >> { %1803 = vmatprep.mubr.msk.bf16.mxu1 %vm2023_vm5, %v2022_v4 }
 0x5bb   : >> { %v1787_v49 = vpop.f32.mrf.mxu1 }
 0x5bc   : >> { %v1164_v50 = vadd.f32 %v1787_v49, %v1678_v48 }
 0x5bd   : >> { %v1158_v51 = vpop.f32.mrf.mxu1 }
 0x5be   : >> { %v1159_v52 = vadd.f32 %v1678_v48, %v1158_v51  ;;  %v1180_v53 = vsel %vm787_vm3, %v1164_v50, -inf  ;;  %v1682_v11 = vmul.f32 -1.442695, %v1164_v50 }
 0x5c0   : >> { %v1179_v54 = vsel %vm787_vm3, %v1159_v52, -inf  ;;  %v1681_v6 = vmul.f32 -1.442695, %v1159_v52 }
 0x5c1   : >> { %v1181_v55 = vmax.f32 %v1179_v54, %v1180_v53 }
 0x5c3   : >> { %v1182_v56 = vrot.slane %v1181_v55, 4 }
 0x5c5   : >> { %v1183_v57 = vmax.f32 %v1181_v55, %v1182_v56 }
 0x5c7   : >> { %v1184_v58 = vrot.slane %v1183_v57, 2 }
 0x5c9   : >> { %v1185_v59 = vmax.f32 %v1183_v57, %v1184_v58 }
 0x5cb   : >> { %v1186_v60 = vrot.slane %v1185_v59, 1 }
 0x5cd   : >> { %v1187_v61 = vmax.f32 %v1185_v59, %v1186_v60 }
 0x5cf   : >> { %v1188_v62 = vsub.f32 %v1159_v52, %v1187_v61  ;;  %v1189_v63 = vsub.f32 %v1164_v50, %v1187_v61 }
 0x5d1   : >> { %v1190_v0 = vmul.f32 1.442695, %v1188_v62  ;;  %v1192_v2 = vmul.f32 1.442695, %v1189_v63 }
 0x5d3   : >> { %1913 = vpow2.f32 %v1190_v0 }
 0x5d4   : >> { %1915 = vpow2.f32 %v1192_v2 }
 0x5d5   : >> { %1917 = vpow2.f32 %v1681_v6 }
 0x5d6   : >> { %1919 = vpow2.f32 %v1682_v11 }
 0x5e0   : >> { %v1914_v3 = vpop.eup %1913 }
 0x5e1   : >> { %v1916_v5 = vpop.eup %1915  ;;  %1196 = vrot.lane.b32.xlu0 %v1914_v3, %s2496_s2 }
 0x5e2   : >> { %1198 = vrot.lane.b32.xlu1 %v1916_v5, %s2496_s2  ;;  %v1918_v12 = vpop.eup %1917 }
 0x5e3   : >> { %v1920_v14 = vpop.eup %1919  ;;  %v1173_v15 = vadd.f32 1.0, %v1918_v12 }
 0x5e4   : >> { %v1174_v17 = vadd.f32 1.0, %v1920_v14 }
 0x5e5   : >> { %1921 = vrcp.f32 %v1173_v15 }
 0x5e6   : >> { %1923 = vrcp.f32 %v1174_v17 }
 0x5f2   : >> { %v1922_v18 = vpop.eup %1921 }
 0x5f3   : >> { %v1924_v21 = vpop.eup %1923 }
 0x653   : >> { %v1197_v20 = vpop.permute.xlu0 %1196 }
 0x654   : >> { %v1199_v22 = vpop.permute.xlu1 %1198  ;;  %v1202_v24 = vmul.f32 %v1922_v18, %v1197_v20 }
 0x655   : >> { %v1203_v25 = vmul.f32 %v1924_v21, %v1199_v22 }
 0x656   : >> { %v1204_v26 = vsel %vm813_vm4, %v1202_v24, 0.0 }
 0x657   : >> { %v1205_v27 = vsel %vm813_vm4, %v1203_v25, 0.0 }
 0x658   : >> { %v1206_v29 = vadd.f32 %v1205_v27, %v1204_v26 }
 0x65a   : >> { %v1207_v30 = vrot.slane %v1206_v29, 4 }
 0x65c   : >> { %v1208_v31 = vadd.f32 %v1207_v30, %v1206_v29 }
 0x65e   : >> { %v1209_v32 = vrot.slane %v1208_v31, 2 }
 0x660   : >> { %v1210_v33 = vadd.f32 %v1209_v32, %v1208_v31 }
 0x662   : >> { %v1211_v34 = vrot.slane %v1210_v33, 1 }
 0x664   : >> { %v1212_v35 = vadd.f32 %v1211_v34, %v1210_v33 }
 0x666   : >> { %1925 = vrcp.f32 %v1212_v35 }
 0x673   : >> { %v1926_v36 = vpop.eup %1925 }
 0x674   : >> { %v1214_v37 = vmul.f32 %v1926_v36, %v1202_v24  ;;  %v1215_v38 = vmul.f32 %v1926_v36, %v1203_v25 }
 0x676   : >> { %1223 = vperm.xlu1 %1889, %v1215_v38   ;;  %1218 = vperm.xlu0 %1890, %v1214_v37  }
 0x6f1   : >> { %v1224_v39 = vpop.permute.xlu1 %1223  ;;  %v1219_v40 = vpop.permute.xlu0 %1218 }
 0x6f2   : >> { %v1227_v41 = vmul.f32 %v1224_v39, %v2340_v46  ;;  %v1226_v42 = vmul.f32 %v1219_v40, %v2336_v43 }
 0x6f4   : >> { %v1229_v44 = vsel %vm693_vm2, %v1227_v41, 0.0  ;;  %v1228_v45 = vsel %vm693_vm2, %v1226_v42, 0.0 }
 0x6f5   : >> { %v1230_v47 = vadd.f32 %v1229_v44, %v1228_v45 }
 0x6f7   : >> { %v1231_v48 = vrot.slane %v1230_v47, 4 }
 0x6f9   : >> { %v1232_v49 = vadd.f32 %v1231_v48, %v1230_v47 }
 0x6fb   : >> { %v1233_v50 = vrot.slane %v1232_v49, 2 }
 0x6fd   : >> { %v1234_v51 = vadd.f32 %v1233_v50, %v1232_v49  ;;  %v1684_v50 = vld [vmem:[%s1256_s21] ss:$0 sm:$0xff]  ;;  %s1693_s21 = sshll.u32 (%p673_p11), %s2145_s17, 4  ;;  %s2025_s17 = smov (%p673_p11), [#allocation3]  }
 0x6fe   : > { %s2417_s27 = scalar_lea.hbm (%p673_p11), %s2473_s18, %s1693_s21  ;;  %s1936_s26 = sshll.u32 (%p673_p11), %s2025_s17, 4  ;;  %s1937_s26 = int_to_ptr.vmem [resolvable:$false] %s1936_s26 }
 0x6ff   : >> { %v1235_v52 = vrot.slane %v1234_v51, 1  ;;  %s1938_s3 = scalar_lea.vmem (%p673_p11), %s1937_s26, 32  ;;  %p1939_p1 = scmp.lt.s32.totalorder (%p673_p11), %s1570_s20, %s1937_s26 }
 0x700   : > { %p1940_p2 = scmp.lt.s32.totalorder (%p673_p11), %s1938_s3, %s1932_s0 }
 0x701   : >> { %v1236_v53 = vadd.f32 %v1235_v52, %v1234_v51 }
 0x702   : > { %p1941_p3 = por (%p673_p11), %p1940_p2, %p1939_p1 }
 0x703   : >> { %v1237_v54 = vsub.f32 %v2336_v43, %v1236_v53  ;;  %v1238_v55 = vsub.f32 %v2340_v46, %v1236_v53  ;;  %v1259_v53 = vld [vmem:[%s1258_s24] sm:$0x1] }
 0x704   : > { %p1942_p4 = pnand (%p673_p11), %p1941_p3, %p1935_p0 }
 0x705   : >> { %v1239_v56 = vmul.f32 %v1237_v54, %v1219_v40  ;;  %v1240_v57 = vmul.f32 %v1238_v55, %v1224_v39  ;;  %v1893_v39 = vld [vmem:[%s1392_s1 + $0x8] sm:$0xff]   ;;  %v1894_v40 = vld [vmem:[%s1392_s1] sm:$0xff]   ;;  %s2499_s1 = sand.u32 (%p673_p11), 1, %s1996_s30  }
 0x706   : >> { %1800 = vmatpush3.bf16.msra.mxu1 %v1893_v39 }
 0x707   : >> { %v1241_v58 = vmul.f32 %v1239_v56, %v1237_v54  ;;  %v1242_v59 = vmul.f32 %v1240_v57, %v1238_v55  ;;  %1801 = vmatprep.subr.bf16.mxu1 %v2022_v4 }
 0x709   : >> { %v1243_v60 = vsel %vm693_vm2, %v1241_v58, 0.0  ;;  %v1244_v61 = vsel %vm693_vm2, %v1242_v59, 0.0 }
 0x70a   : >> { %v1245_v62 = vadd.f32 %v1244_v61, %v1243_v60  ;;  %1802 = vmatpush3.bf16.msra.mxu1 %v1894_v40 }
 0x70c   : >> { %v1246_v63 = vrot.slane %v1245_v62, 4 }
 0x70e   : >> { %v1247_v0 = vadd.f32 %v1246_v63, %v1245_v62 }
 0x710   : >> { %v1248_v2 = vrot.slane %v1247_v0, 2 }
 0x712   : >> { %v1249_v3 = vadd.f32 %v1248_v2, %v1247_v0  ;;  %v1686_v2 = vld [vmem:[%s1397_s25] ss:$0 sm:$0xff]  ;;  %s1557_s25 = scalar_lea.sflag (%p673_p11), [#allocation4], %s2499_s1 }
 0x714   : >> { %v1250_v5 = vrot.slane %v1249_v3, 1 }
 0x716   : >> { %v1251_v6 = vadd.f32 %v1250_v5, %v1249_v3 }
 0x718   : >> { %v1252_v11 = vadd.f32 1e-05, %v1251_v6 }
 0x71a   : >> { %1927 = vrsqrt.f32 %v1252_v11 }
 0x727   : >> { %v1928_v43 = vpop.eup %1927 }
 0x728   : >> { %v1254_v12 = vmul.f32 %v1928_v43, %v1237_v54  ;;  %v1255_v46 = vmul.f32 %v1928_v43, %v1238_v55 }
 0x72a   : >> { %v1260_v14 = vsel %vm693_vm2, %v1254_v12, 0.0  ;;  %v1261_v15 = vsel %vm693_vm2, %v1255_v46, 0.0  ;;  %v1269_v17 = vmul.f32 %v1254_v12, %v1254_v12  ;;  %v1270_v18 = vmul.f32 %v1255_v46, %v1255_v46 }
 0x72b   : >> { %v1262_v20 = vadd.f32 %v1261_v15, %v1260_v14 }
 0x72c   : >> { %v1271_v21 = vsel %vm693_vm2, %v1269_v17, 0.0  ;;  %v1272_v22 = vsel %vm693_vm2, %v1270_v18, 0.0 }
 0x72d   : >> { %v1263_v24 = vrot.slane %v1262_v20, 4  ;;  %v1273_v25 = vadd.f32 %v1272_v22, %v1271_v21 }
 0x72f   : >> { %v1264_v26 = vadd.f32 %v1263_v24, %v1262_v20  ;;  %v1274_v27 = vrot.slane %v1273_v25, 4 }
 0x731   : >> { %v1265_v29 = vrot.slane %v1264_v26, 2  ;;  %v1275_v30 = vadd.f32 %v1274_v27, %v1273_v25 }
 0x733   : >> { %v1266_v31 = vadd.f32 %v1265_v29, %v1264_v26  ;;  %v1276_v32 = vrot.slane %v1275_v30, 2 }
 0x735   : >> { %v1267_v33 = vrot.slane %v1266_v31, 1  ;;  %v1277_v34 = vadd.f32 %v1276_v32, %v1275_v30 }
 0x737   : >> { %v1278_v35 = vrot.slane %v1277_v34, 1  ;;  %v1268_v36 = vadd.f32 %v1267_v33, %v1266_v31 }
 0x739   : >> { %v1279_v37 = vadd.f32 %v1278_v35, %v1277_v34 }
 0x73b   : >> { %v1280_v38 = vsel %vm890_vm6, %v1268_v36, %v1279_v37 }
 0x73c   : >> { %1797 = vmatmul.mubr.msk.f32.vlgmr.msra.gmra.mxu0 %vm693_vm2, %v1280_v38 }
 0x73d   : > { %1811 = vmatprep.mubr.msk.f32.mxu0 (%p673_p11), %vm2019_vm0, %v2018_v1 }
 0x7fc   : >> { %v1350_v41 = vpop.f32.mrf.mxu0 }
 0x7fd   : >> { %v1354_v42 = vmul.f32 %v1350_v41, %v1350_v41 }
 0x7fe   : >> { %v1798_v44 = vpop.f32.mrf.mxu0 }
 0x7ff   : >> { %v1356_v45 = vrot.slane %v1354_v42, 7 }
 0x801   : >> { %v1358_v47 = vsub.f32 %v1350_v41, %v1356_v45 }
 0x803   : >> { %v1359_v48 = vmax.f32 %v1358_v47, 0.0 }
 0x805   : >> { %v1360_v49 = vadd.f32 1e-05, %v1359_v48 }
 0x807   : >> { %1929 = vrsqrt.f32 %v1360_v49 }
 0x814   : >> { %v1930_v51 = vpop.eup %1929 }
 0x815   : >> { %v1368_v4 = vmul.f32 %v1930_v51, %v1684_v50 }
 0x817   : >> { %v1370_v52 = vrot.slane %v1368_v4, 1  ;;  %v1377_v55 = vrot.slane %v1368_v4, %v987_v23 }
 0x819   : >> { %v1372_v54 = vmul.f32 %v1370_v52, %v1350_v41  ;;  %v1378_v57 = vmul.f32 %v1377_v55, %v1254_v12  ;;  %v1379_v58 = vmul.f32 %v1377_v55, %v1255_v46  ;;  %v2024_v46 = vmov (%p673_p11), 0  }
 0x81a   : > { %1931 = vset.pattern.permute.xlu0 (%p673_p11), %v2024_v46 }
 0x81b   : >> { %v1373_v56 = vsub.f32 %v1259_v53, %v1372_v54 }
 0x81d   : >> { %v1384_v59 = vrot.slane %v1373_v56, %v2315_v28 }
 0x81f   : >> { %v1386_v60 = vadd.f32 %v1384_v59, %v1378_v57  ;;  %v1387_v61 = vadd.f32 %v1384_v59, %v1379_v58 }
 0x821   : >> { %v1388_v62 = vmax.f32 %v1386_v60, 0.0  ;;  %v1389_v63 = vmax.f32 %v1387_v61, 0.0 }
 0x823   : >> { %v1390_v0 = vpack.c.bf16 %v1389_v63, %v1388_v62 }
 0x825   : >> { %1804 = vmatmul.mubr.msk.bf16.vlgmr.msra.gmra.mxu1 %vm693_vm2, %v1390_v0 }
 0x8e5   : >> { %v1454_v3 = vpop.f32.mrf.mxu1 }
 0x8e6   : >> { %v1455_v19 = vadd.f32 %v1686_v2, %v1454_v3 }
 0x8e7   : >> { %v1805_v23 = vpop.f32.mrf.mxu1 }
 0x8e8   : >> { %v1461_v5 = vadd.f32 %v2012_v13, %v1455_v19  }
 0x8e9   : >> { %v1457_v6 = vpop.f32.mrf.mxu1 }
 0x8ea   : >> { %v1458_v11 = vadd.f32 %v1686_v2, %v1457_v6  ;;  %v2498_v13 = vmov %v1461_v5  ;;  %675 = sbr.rel (!%p673_p11) target bundleno = 243 (0xf3), region = 146 }
 0x8eb   : >> { %v1806_v43 = vpop.f32.mrf.mxu1  ;;  %v1464_v13 = vld [vmem:[#allocation2] sm:$0x1] (%p673_p11) }
 0x8ec   : >> { %v1462_v12 = vadd.f32 %v2008_v16, %v1458_v11   ;;  %1467 = vperm.xlu0 (%p673_p11), %1931, %v1464_v13  }
 0x8ee   : >> { %v2497_v16 = vmov %v1462_v12  ;;  %1808 = vmatpush3.xpose.msk.msra.mxu0 (%p673_p11), %vm693_vm2, %v1462_v12 }
 0x8ef   : > { %1809 = vmatprep.subr.mxu0 %v2018_v1 }
 0x8f2   : > { %1810 = vmatpush3.xpose.msk.msra.mxu0 %vm693_vm2, %v1461_v5 }
 0x8f5   : > { %1812 = vmatmul.mubr.msk.f32.vlgmr.msra.gmra.mxu0 %vm693_vm2, %v1463_v7 }
 0x967   : > { %v1468_v8 = vpop.permute.xlu0 %1467 }
 0x968   : > { %v1473_v9 = vrot.slane %v1468_v8, %v2315_v28 }
 0x9b5   : > { %v1550_v10 = vpop.f32.mrf.mxu0 }
 0x9b6   : > { %v1551_v16 = vadd.f32 %v1550_v10, %v1473_v9 }
 0x9b7   : > { %v1813_v1 = vpop.f32.mrf.mxu0 }
 0x9b8   : > { %1555 = vst.msk [vmem:[%s2221_s22] sm:$0x1] %vm1554_vm7, %v1551_v16 }
 0x9b9   : > { %1945 = shalt.err (!%p1942_p4)
}
 0x9ba   : > { %s1946_s22 = scalar_lea.hbm %s2417_s27, 16  ;;  %s1950_s24 = scalar_lea.hbm %s2473_s18, 32 }
 0x9bb   : > { %p1947_p7 = scmp.ne.s32.totalorder %s2417_s27, %s1946_s22  ;;  %p1951_p10 = scmp.lt.s32.totalorder %s2417_s27, %s2473_s18 }
 0x9bc   : > { %p1952_p11 = scmp.lt.s32.totalorder %s1950_s24, %s1946_s22 }
 0x9bd   : > { %p1948_p8 = pnand %p1947_p7, %p2162_p5 }
 0x9be   : > { %p1953_p12 = por %p1952_p11, %p1951_p10 }
 0x9bf   : > { %p1949_p9 = pneg %p1948_p8 }
 0x9c1   : > { %p1954_p13 = pnand %p1953_p12, %p1949_p9 }
 0x9c3   : > { %1957 = shalt.err (!%p1954_p13)
}
 0x9c4   : > { %1814 = dma.vmem_to_hbm [thread:$0]  (%p2162_p5), %s1570_s20, 16, %s2417_s27, %s1557_s25  }
 0x9c5 PF: > { %p1820_p0 = scmp.ge.s32.totalorder %s2004_s19, 2  ;;  %s1581_s0 = sand.u32 1, %s1992_s29  }
 0x9c6   : > { %s1582_s26 = scalar_lea.sflag [#allocation4], %s1581_s0 }
 0x9c7   : > { %p1817_p1 = pnand %p1820_p0, %p2166_p6 }
 0x9c9   : > { %p1818_p2 = pneg %p1817_p1 }
 0x9cb   : > { %1987 = dma.done.wait (%p1818_p2), %s1582_s26, 16  }
 0x9cc   : > { %1989 = vsyncadd (%p1818_p2), %s1582_s26, 4294967280  ;;  %s2501_s19 = sld [smem:[#allocation7_spill]]  ;;  %s2504_s29 = smov %s1996_s30 }
 0x9cd   : > { %s2502_s22 = sld [smem:[#allocation6_spill]] }
 0x9ce   : > { %s2503_s0 = sld [smem:[#allocation8_spill]] }
 0x9d2   : > { %p30_p3 = scmp.ge.s32.totalorder %s2501_s19, 4  }
 0x9d3   : > { %s2505_s30 = smov %s2502_s22 }
 0x9d4   :  { %32 = sbr.rel (!%p30_p3) target bundleno = 8 (0x8), region = 157 }
 0x9d9   :  { %1586 = vsyncpa [#allocation4], 1 }
 0x9da   :  { %1588 = vsyncpa [#allocation4 + $0x1], 1 }

</bundles_post_ra>
